<compile_context>
chip_gen: v7x
topology: tpu7x:2x2x1
jax: 0.10.0
libtpu: 0.0.40
codegen_flags: <defaults>
</compile_context>

<pallas_src>
import jax
import jax.numpy as jnp
import numpy as np
from jax.experimental import pallas as pl
from jax.experimental.pallas import tpu as pltpu

# Module hyper-parameters (globals in the original code/model.py)
HIDDEN_SIZE = 32
OUTPUT_SIZE = 4
LSTM_DROPOUT = 0.5     # identity in eval mode
EMBED_DIM = 201        # GloVe-201 as in create_emb_layer
VOCAB_SIZE = 50
BATCH = 2
SEQ_LEN = 8
OUT_PAD = 128          # lane-dense output slab width


def _bilstm_kernel(tok_ref,          # SMEM (B, T) int32 token ids
                   emb_ref,          # VMEM (V, E)      embedding table
                   wih_ref,          # VMEM (E, 8H)     fused input weights (gate-major interleaved)
                   bih_ref,          # VMEM (1, 8H)     folded b_ih + b_hh, same column order
                   whh_ref,          # VMEM (2H, 8H)    block-diagonal recurrent weights
                   wfc_ref,          # VMEM (2H, OUT_PAD)
                   bfc_ref,          # VMEM (1, OUT_PAD)
                   out_ref,          # VMEM (B, OUT_PAD)
                   proj_ref):        # VMEM scratch (V, 8H) per-token gate preactivations
    B, T = tok_ref.shape
    H2 = whh_ref.shape[0]            # 2H   (forward | backward state width)
    G = whh_ref.shape[1]             # 8H   (4 gates x 2 directions)

    # --- One-time fused input projection for every vocab entry (bias folded). ---
    # proj[v] = emb[v] @ Wih_cat + b_cat.  Single big MXU pass, off the serial chain.
    proj_ref[...] = (jnp.dot(emb_ref[...], wih_ref[...],
                             preferred_element_type=jnp.float32)
                     + bih_ref[...])

    whh = whh_ref[...]

    # Static lane masks (iota-based, no data movement).
    lane = jax.lax.broadcasted_iota(jnp.int32, (B, G), 1)
    # Forward-direction lanes: first H lanes of each 2H-wide gate block.
    fwd_mask = (lane % H2) < (H2 // 2)
    # g-gate (tanh) lanes: third gate block [2*H2, 3*H2).
    g_mask = (lane >= 2 * H2) & (lane < 3 * H2)

    h = jnp.zeros((B, H2), jnp.float32)      # [h_fwd | h_bwd]
    c = jnp.zeros((B, H2), jnp.float32)      # [c_fwd | c_bwd]

    # Fused bidirectional recurrence: at step t the forward half consumes the
    # precomputed gates of token x[t], the backward half those of x[T-1-t].
    for t in range(T):                       # T is small & static -> fully unrolled
        rows_f = [proj_ref[pl.ds(tok_ref[b, t], 1), :] for b in range(B)]
        rows_b = [proj_ref[pl.ds(tok_ref[b, T - 1 - t], 1), :] for b in range(B)]
        xg_f = jnp.concatenate(rows_f, axis=0)          # (B, 8H)
        xg_b = jnp.concatenate(rows_b, axis=0)          # (B, 8H)
        xg = jnp.where(fwd_mask, xg_f, xg_b)            # VPU select, no shuffles

        gates = xg + jnp.dot(h, whh, preferred_element_type=jnp.float32)

        # Full-vreg nonlinearities + static-mask blend (avoids 32-lane sub-slices
        # before the EUP ops).
        act = jnp.where(g_mask, jnp.tanh(gates), jax.nn.sigmoid(gates))

        i_g = act[:, 0 * H2:1 * H2]          # [i_f | i_b]
        f_g = act[:, 1 * H2:2 * H2]          # [f_f | f_b]
        g_g = act[:, 2 * H2:3 * H2]          # [g_f | g_b]
        o_g = act[:, 3 * H2:4 * H2]          # [o_f | o_b]

        c = f_g * c + i_g * g_g
        h = o_g * jnp.tanh(c)

    # h == cat(hidden[-2], hidden[-1], dim=1); dropout is identity in eval mode.
    out_ref[...] = (jnp.dot(h, wfc_ref[...], preferred_element_type=jnp.float32)
                    + bfc_ref[...])


def pack_params(params):
    """One-time repack of natural-layout params into the fused kernel layout."""
    H = HIDDEN_SIZE

    def interleave_cols(wf, wb):
        # Per-gate column blocks ordered [fwd | bwd]:  [i_f i_b f_f f_b g_f g_b o_f o_b]
        blocks = []
        for g in range(4):
            blocks.append(wf[..., g * H:(g + 1) * H])
            blocks.append(wb[..., g * H:(g + 1) * H])
        return jnp.concatenate(blocks, axis=-1)

    wih_cat = interleave_cols(params["wih_f"], params["wih_b"])     # (E, 8H)
    b_cat = interleave_cols(params["b_f"], params["b_b"])           # (1, 8H)

    # Block-diagonal recurrent weight: rows = [h_fwd | h_bwd], columns gate-major.
    zf = jnp.zeros((H, H), jnp.float32)
    whh_blocks = []
    for g in range(4):
        fwd_col = jnp.concatenate([params["whh_f"][:, g * H:(g + 1) * H], zf], axis=0)
        bwd_col = jnp.concatenate([zf, params["whh_b"][:, g * H:(g + 1) * H]], axis=0)
        whh_blocks.append(jnp.concatenate([fwd_col, bwd_col], axis=1))
    whh_cat = jnp.concatenate(whh_blocks, axis=1)                   # (2H, 8H)

    # Lane-padded FC weights (kernel writes a lane-dense (B, 128) slab).
    wfc_pad = jnp.zeros((2 * H, OUT_PAD), jnp.float32).at[:, :OUTPUT_SIZE].set(params["wfc"])
    bfc_pad = jnp.zeros((1, OUT_PAD), jnp.float32).at[:, :OUTPUT_SIZE].set(params["bfc"])

    return {
        "embedding": params["embedding"],
        "wih_cat": wih_cat,
        "b_cat": b_cat,
        "whh_cat": whh_cat,
        "wfc_pad": wfc_pad,
        "bfc_pad": bfc_pad,
    }


def bi_lstm_forward(token_ids, packed):
    """token_ids: (B, T) int32.  Returns (B, OUTPUT_SIZE) float32."""
    B = token_ids.shape[0]
    vmem = pl.BlockSpec(memory_space=pltpu.MemorySpace.VMEM)
    smem = pl.BlockSpec(memory_space=pltpu.MemorySpace.SMEM)

    out_pad = pl.pallas_call(
        _bilstm_kernel,
        out_shape=jax.ShapeDtypeStruct((B, OUT_PAD), jnp.float32),
        in_specs=[smem, vmem, vmem, vmem, vmem, vmem, vmem],
        out_specs=vmem,
        scratch_shapes=[pltpu.VMEM((VOCAB_SIZE, 8 * HIDDEN_SIZE), jnp.float32)],
    )(
        token_ids,
        packed["embedding"],
        packed["wih_cat"], packed["b_cat"], packed["whh_cat"],
        packed["wfc_pad"], packed["bfc_pad"],
    )
    return out_pad[:, :OUTPUT_SIZE]


def init_params(key):
    """Deterministic synthetic parameters matching the nn.Module shapes."""
    ks = jax.random.split(key, 12)
    H, E, O, V = HIDDEN_SIZE, EMBED_DIM, OUTPUT_SIZE, VOCAB_SIZE
    s = 0.1

    def u(k, shape):
        return jax.random.uniform(k, shape, jnp.float32, -s, s)

    # LSTM weights stored pre-transposed for x @ W layout: (in, 4H), gate order i,f,g,o.
    # PyTorch's b_ih + b_hh are folded into a single bias per direction.
    params = {
        "embedding": u(ks[0], (V, E)),
        "wih_f": u(ks[1], (E, 4 * H)),
        "whh_f": u(ks[2], (H, 4 * H)),
        "b_f":   u(ks[3], (1, 4 * H)),
        "wih_b": u(ks[4], (E, 4 * H)),
        "whh_b": u(ks[5], (H, 4 * H)),
        "b_b":   u(ks[6], (1, 4 * H)),
        "wfc":   u(ks[7], (2 * H, O)),
        "bfc":   u(ks[8], (1, O)),
    }
    return params


def bi_lstm_reference(token_ids, params):
    """Pure-JAX reference (same math) for a correctness check."""
    H = HIDDEN_SIZE
    x = params["embedding"][token_ids]                    # (B, T, E)
    B, T, _ = x.shape

    def step(x_t, h, c, wih, whh, b):
        g = x_t @ wih + h @ whh + b
        i = jax.nn.sigmoid(g[:, 0 * H:1 * H])
        f = jax.nn.sigmoid(g[:, 1 * H:2 * H])
        gg = jnp.tanh(g[:, 2 * H:3 * H])
        o = jax.nn.sigmoid(g[:, 3 * H:4 * H])
        c = f * c + i * gg
        h = o * jnp.tanh(c)
        return h, c

    z = jnp.zeros((B, H), jnp.float32)
    h_f, c_f = z, z
    for t in range(T):
        h_f, c_f = step(x[:, t], h_f, c_f, params["wih_f"], params["whh_f"], params["b_f"])
    h_b, c_b = z, z
    for t in range(T - 1, -1, -1):
        h_b, c_b = step(x[:, t], h_b, c_b, params["wih_b"], params["whh_b"], params["b_b"])
    h_cat = jnp.concatenate([h_f, h_b], axis=1)
    return h_cat @ params["wfc"] + params["bfc"]


if __name__ == "__main__":
    key = jax.random.PRNGKey(0)
    k_param, k_tok = jax.random.split(key)
    params = init_params(k_param)
    packed = pack_params(params)
    token_ids = jax.random.randint(k_tok, (BATCH, SEQ_LEN), 0, VOCAB_SIZE, dtype=jnp.int32)

    out = bi_lstm_forward(token_ids, packed)
    out = jax.block_until_ready(out)

    ref = bi_lstm_reference(token_ids, params)
    assert out.shape == (BATCH, OUTPUT_SIZE), out.shape
    np.testing.assert_allclose(np.asarray(out), np.asarray(ref), atol=1e-2, rtol=1e-2)

    print("KERNEL_OK")
</pallas_src>

<mosaic_0001>
module attributes {stable_mosaic.version = 11 : i64} {
  func.func @_bilstm_kernel(%arg0: memref<2x8xi32, #tpu.memory_space<smem>>, %arg1: memref<50x201xf32, #tpu.memory_space<vmem>>, %arg2: memref<201x256xf32, #tpu.memory_space<vmem>>, %arg3: memref<1x256xf32, #tpu.memory_space<vmem>>, %arg4: memref<64x256xf32, #tpu.memory_space<vmem>>, %arg5: memref<64x128xf32, #tpu.memory_space<vmem>>, %arg6: memref<1x128xf32, #tpu.memory_space<vmem>>, %arg7: memref<2x128xf32, #tpu.memory_space<vmem>>, %arg8: memref<50x256xf32, #tpu.memory_space<vmem>>) attributes {dimension_semantics = [], scalar_prefetch = 0 : i64, scratch_operands = 1 : i64, tpu.core_type = #tpu.core_type<tc>} {
    %c0 = arith.constant 0 : index
    %c0_0 = arith.constant 0 : index
    %0 = vector.load %arg1[%c0, %c0_0] : memref<50x201xf32, #tpu.memory_space<vmem>>, vector<50x201xf32>
    %c0_1 = arith.constant 0 : index
    %c0_2 = arith.constant 0 : index
    %1 = vector.load %arg2[%c0_1, %c0_2] : memref<201x256xf32, #tpu.memory_space<vmem>>, vector<201x256xf32>
    %cst = arith.constant dense<0.000000e+00> : vector<50x256xf32>
    %2 = tpu.matmul %0, %1, %cst {dimension_numbers = #tpu.dot_dimension_numbers<[1], [0], [0], [1], [0, 0, 1, 1], [], []>} : vector<50x201xf32>, vector<201x256xf32>, vector<50x256xf32> -> vector<50x256xf32>
    %c0_3 = arith.constant 0 : index
    %c0_4 = arith.constant 0 : index
    %3 = vector.load %arg3[%c0_3, %c0_4] : memref<1x256xf32, #tpu.memory_space<vmem>>, vector<1x256xf32>
    %4 = vector.broadcast %3 : vector<1x256xf32> to vector<50x256xf32>
    %5 = arith.addf %2, %4 : vector<50x256xf32>
    %c0_5 = arith.constant 0 : index
    %c0_6 = arith.constant 0 : index
    %6 = vector.load %arg8[%c0_5, %c0_6] : memref<50x256xf32, #tpu.memory_space<vmem>>, vector<50x256xf32>
    tpu.vector_store %arg8[%c0_5, %c0_6], %5 {strides = array<i32>} : memref<50x256xf32, #tpu.memory_space<vmem>>, vector<50x256xf32>,
    %c0_7 = arith.constant 0 : index
    %c0_8 = arith.constant 0 : index
    %7 = vector.load %arg4[%c0_7, %c0_8] : memref<64x256xf32, #tpu.memory_space<vmem>>, vector<64x256xf32>
    %8 = tpu.iota {dimensions = array<i32: 1>} : vector<2x256xi32>
    %c64_i32 = arith.constant 64 : i32
    %c0_i32 = arith.constant 0 : i32
    %9 = arith.cmpi eq, %c64_i32, %c0_i32 : i32
    %c1_i32 = arith.constant 1 : i32
    %10 = arith.select %9, %c1_i32, %c64_i32 : i32
    %11 = vector.broadcast %10 : i32 to vector<2x256xi32>
    %12 = arith.remsi %8, %11 : vector<2x256xi32>
    %c0_i32_9 = arith.constant 0 : i32
    %13 = vector.broadcast %c0_i32_9 : i32 to vector<2x256xi32>
    %14 = arith.cmpi ne, %12, %13 : vector<2x256xi32>
    %c0_i32_10 = arith.constant 0 : i32
    %15 = vector.broadcast %c0_i32_10 : i32 to vector<2x256xi32>
    %16 = arith.cmpi slt, %12, %15 : vector<2x256xi32>
    %c0_i32_11 = arith.constant 0 : i32
    %17 = arith.cmpi slt, %10, %c0_i32_11 : i32
    %18 = vector.broadcast %17 : i1 to vector<2x256xi1>
    %19 = vector.broadcast %18 : vector<2x256xi1> to vector<2x256xi1>
    %20 = arith.xori %16, %19 : vector<2x256xi1>
    %21 = arith.andi %20, %14 : vector<2x256xi1>
    %22 = vector.broadcast %10 : i32 to vector<2x256xi32>
    %23 = arith.addi %12, %22 : vector<2x256xi32>
    %24 = arith.select %21, %23, %12 : vector<2x256xi1>, vector<2x256xi32>
    %c32_i32 = arith.constant 32 : i32
    %25 = vector.broadcast %c32_i32 : i32 to vector<2x256xi32>
    %26 = arith.cmpi slt, %24, %25 : vector<2x256xi32>
    %c128_i32 = arith.constant 128 : i32
    %27 = vector.broadcast %c128_i32 : i32 to vector<2x256xi32>
    %28 = arith.cmpi sge, %8, %27 : vector<2x256xi32>
    %c192_i32 = arith.constant 192 : i32
    %29 = vector.broadcast %c192_i32 : i32 to vector<2x256xi32>
    %30 = arith.cmpi slt, %8, %29 : vector<2x256xi32>
    %31 = arith.andi %28, %30 : vector<2x256xi1>
    %cst_12 = arith.constant 0.000000e+00 : f32
    %32 = vector.broadcast %cst_12 : f32 to vector<2x64xf32>
    %cst_13 = arith.constant 0.000000e+00 : f32
    %33 = vector.broadcast %cst_13 : f32 to vector<2x64xf32>
    %c0_14 = arith.constant 0 : index
    %c0_15 = arith.constant 0 : index
    %34 = memref.load %arg0[%c0_14, %c0_15] : memref<2x8xi32, #tpu.memory_space<smem>>
    %35 = arith.index_cast %34 : i32 to index
    %c0_16 = arith.constant 0 : index
    %36 = vector.load %arg8[%35, %c0_16] : memref<50x256xf32, #tpu.memory_space<vmem>>, vector<1x256xf32>
    %c1 = arith.constant 1 : index
    %c0_17 = arith.constant 0 : index
    %37 = memref.load %arg0[%c1, %c0_17] : memref<2x8xi32, #tpu.memory_space<smem>>
    %38 = arith.index_cast %37 : i32 to index
    %c0_18 = arith.constant 0 : index
    %39 = vector.load %arg8[%38, %c0_18] : memref<50x256xf32, #tpu.memory_space<vmem>>, vector<1x256xf32>
    %c0_19 = arith.constant 0 : index
    %c7 = arith.constant 7 : index
    %40 = memref.load %arg0[%c0_19, %c7] : memref<2x8xi32, #tpu.memory_space<smem>>
    %41 = arith.index_cast %40 : i32 to index
    %c0_20 = arith.constant 0 : index
    %42 = vector.load %arg8[%41, %c0_20] : memref<50x256xf32, #tpu.memory_space<vmem>>, vector<1x256xf32>
    %c1_21 = arith.constant 1 : index
    %c7_22 = arith.constant 7 : index
    %43 = memref.load %arg0[%c1_21, %c7_22] : memref<2x8xi32, #tpu.memory_space<smem>>
    %44 = arith.index_cast %43 : i32 to index
    %c0_23 = arith.constant 0 : index
    %45 = vector.load %arg8[%44, %c0_23] : memref<50x256xf32, #tpu.memory_space<vmem>>, vector<1x256xf32>
    %46 = tpu.concatenate %36, %39 in 0 : vector<1x256xf32>, vector<1x256xf32> -> vector<2x256xf32>
    %47 = tpu.concatenate %42, %45 in 0 : vector<1x256xf32>, vector<1x256xf32> -> vector<2x256xf32>
    %48 = arith.select %26, %46, %47 : vector<2x256xi1>, vector<2x256xf32>
    %cst_24 = arith.constant dense<0.000000e+00> : vector<2x256xf32>
    %49 = tpu.matmul %32, %7, %cst_24 {dimension_numbers = #tpu.dot_dimension_numbers<[1], [0], [0], [1], [0, 0, 1, 1], [], []>} : vector<2x64xf32>, vector<64x256xf32>, vector<2x256xf32> -> vector<2x256xf32>
    %50 = arith.addf %48, %49 : vector<2x256xf32>
    %51 = math.tanh %50 : vector<2x256xf32>
    %52 = arith.negf %50 : vector<2x256xf32>
    %53 = math.exp %52 : vector<2x256xf32>
    %cst_25 = arith.constant 1.000000e+00 : f32
    %54 = vector.broadcast %cst_25 : f32 to vector<2x256xf32>
    %55 = arith.addf %54, %53 : vector<2x256xf32>
    %56 = arith.divf %54, %55 : vector<2x256xf32>
    %57 = arith.select %31, %51, %56 : vector<2x256xi1>, vector<2x256xf32>
    %58 = vector.extract_strided_slice %57 {offsets = [0, 0], sizes = [2, 64], strides = [1, 1]} : vector<2x256xf32> to vector<2x64xf32>
    %59 = vector.extract_strided_slice %57 {offsets = [0, 64], sizes = [2, 64], strides = [1, 1]} : vector<2x256xf32> to vector<2x64xf32>
    %60 = vector.extract_strided_slice %57 {offsets = [0, 128], sizes = [2, 64], strides = [1, 1]} : vector<2x256xf32> to vector<2x64xf32>
    %61 = vector.extract_strided_slice %57 {offsets = [0, 192], sizes = [2, 64], strides = [1, 1]} : vector<2x256xf32> to vector<2x64xf32>
    %62 = arith.mulf %59, %33 : vector<2x64xf32>
    %63 = arith.mulf %58, %60 : vector<2x64xf32>
    %64 = arith.addf %62, %63 : vector<2x64xf32>
    %65 = math.tanh %64 : vector<2x64xf32>
    %66 = arith.mulf %61, %65 : vector<2x64xf32>
    %c0_26 = arith.constant 0 : index
    %c1_27 = arith.constant 1 : index
    %67 = memref.load %arg0[%c0_26, %c1_27] : memref<2x8xi32, #tpu.memory_space<smem>>
    %68 = arith.index_cast %67 : i32 to index
    %c0_28 = arith.constant 0 : index
    %69 = vector.load %arg8[%68, %c0_28] : memref<50x256xf32, #tpu.memory_space<vmem>>, vector<1x256xf32>
    %c1_29 = arith.constant 1 : index
    %c1_30 = arith.constant 1 : index
    %70 = memref.load %arg0[%c1_29, %c1_30] : memref<2x8xi32, #tpu.memory_space<smem>>
    %71 = arith.index_cast %70 : i32 to index
    %c0_31 = arith.constant 0 : index
    %72 = vector.load %arg8[%71, %c0_31] : memref<50x256xf32, #tpu.memory_space<vmem>>, vector<1x256xf32>
    %c0_32 = arith.constant 0 : index
    %c6 = arith.constant 6 : index
    %73 = memref.load %arg0[%c0_32, %c6] : memref<2x8xi32, #tpu.memory_space<smem>>
    %74 = arith.index_cast %73 : i32 to index
    %c0_33 = arith.constant 0 : index
    %75 = vector.load %arg8[%74, %c0_33] : memref<50x256xf32, #tpu.memory_space<vmem>>, vector<1x256xf32>
    %c1_34 = arith.constant 1 : index
    %c6_35 = arith.constant 6 : index
    %76 = memref.load %arg0[%c1_34, %c6_35] : memref<2x8xi32, #tpu.memory_space<smem>>
    %77 = arith.index_cast %76 : i32 to index
    %c0_36 = arith.constant 0 : index
    %78 = vector.load %arg8[%77, %c0_36] : memref<50x256xf32, #tpu.memory_space<vmem>>, vector<1x256xf32>
    %79 = tpu.concatenate %69, %72 in 0 : vector<1x256xf32>, vector<1x256xf32> -> vector<2x256xf32>
    %80 = tpu.concatenate %75, %78 in 0 : vector<1x256xf32>, vector<1x256xf32> -> vector<2x256xf32>
    %81 = arith.select %26, %79, %80 : vector<2x256xi1>, vector<2x256xf32>
    %cst_37 = arith.constant dense<0.000000e+00> : vector<2x256xf32>
    %82 = tpu.matmul %66, %7, %cst_37 {dimension_numbers = #tpu.dot_dimension_numbers<[1], [0], [0], [1], [0, 0, 1, 1], [], []>} : vector<2x64xf32>, vector<64x256xf32>, vector<2x256xf32> -> vector<2x256xf32>
    %83 = arith.addf %81, %82 : vector<2x256xf32>
    %84 = math.tanh %83 : vector<2x256xf32>
    %85 = arith.negf %83 : vector<2x256xf32>
    %86 = math.exp %85 : vector<2x256xf32>
    %cst_38 = arith.constant 1.000000e+00 : f32
    %87 = vector.broadcast %cst_38 : f32 to vector<2x256xf32>
    %88 = arith.addf %87, %86 : vector<2x256xf32>
    %89 = arith.divf %87, %88 : vector<2x256xf32>
    %90 = arith.select %31, %84, %89 : vector<2x256xi1>, vector<2x256xf32>
    %91 = vector.extract_strided_slice %90 {offsets = [0, 0], sizes = [2, 64], strides = [1, 1]} : vector<2x256xf32> to vector<2x64xf32>
    %92 = vector.extract_strided_slice %90 {offsets = [0, 64], sizes = [2, 64], strides = [1, 1]} : vector<2x256xf32> to vector<2x64xf32>
    %93 = vector.extract_strided_slice %90 {offsets = [0, 128], sizes = [2, 64], strides = [1, 1]} : vector<2x256xf32> to vector<2x64xf32>
    %94 = vector.extract_strided_slice %90 {offsets = [0, 192], sizes = [2, 64], strides = [1, 1]} : vector<2x256xf32> to vector<2x64xf32>
    %95 = arith.mulf %92, %64 : vector<2x64xf32>
    %96 = arith.mulf %91, %93 : vector<2x64xf32>
    %97 = arith.addf %95, %96 : vector<2x64xf32>
    %98 = math.tanh %97 : vector<2x64xf32>
    %99 = arith.mulf %94, %98 : vector<2x64xf32>
    %c0_39 = arith.constant 0 : index
    %c2 = arith.constant 2 : index
    %100 = memref.load %arg0[%c0_39, %c2] : memref<2x8xi32, #tpu.memory_space<smem>>
    %101 = arith.index_cast %100 : i32 to index
    %c0_40 = arith.constant 0 : index
    %102 = vector.load %arg8[%101, %c0_40] : memref<50x256xf32, #tpu.memory_space<vmem>>, vector<1x256xf32>
    %c1_41 = arith.constant 1 : index
    %c2_42 = arith.constant 2 : index
    %103 = memref.load %arg0[%c1_41, %c2_42] : memref<2x8xi32, #tpu.memory_space<smem>>
    %104 = arith.index_cast %103 : i32 to index
    %c0_43 = arith.constant 0 : index
    %105 = vector.load %arg8[%104, %c0_43] : memref<50x256xf32, #tpu.memory_space<vmem>>, vector<1x256xf32>
    %c0_44 = arith.constant 0 : index
    %c5 = arith.constant 5 : index
    %106 = memref.load %arg0[%c0_44, %c5] : memref<2x8xi32, #tpu.memory_space<smem>>
    %107 = arith.index_cast %106 : i32 to index
    %c0_45 = arith.constant 0 : index
    %108 = vector.load %arg8[%107, %c0_45] : memref<50x256xf32, #tpu.memory_space<vmem>>, vector<1x256xf32>
    %c1_46 = arith.constant 1 : index
    %c5_47 = arith.constant 5 : index
    %109 = memref.load %arg0[%c1_46, %c5_47] : memref<2x8xi32, #tpu.memory_space<smem>>
    %110 = arith.index_cast %109 : i32 to index
    %c0_48 = arith.constant 0 : index
    %111 = vector.load %arg8[%110, %c0_48] : memref<50x256xf32, #tpu.memory_space<vmem>>, vector<1x256xf32>
    %112 = tpu.concatenate %102, %105 in 0 : vector<1x256xf32>, vector<1x256xf32> -> vector<2x256xf32>
    %113 = tpu.concatenate %108, %111 in 0 : vector<1x256xf32>, vector<1x256xf32> -> vector<2x256xf32>
    %114 = arith.select %26, %112, %113 : vector<2x256xi1>, vector<2x256xf32>
    %cst_49 = arith.constant dense<0.000000e+00> : vector<2x256xf32>
    %115 = tpu.matmul %99, %7, %cst_49 {dimension_numbers = #tpu.dot_dimension_numbers<[1], [0], [0], [1], [0, 0, 1, 1], [], []>} : vector<2x64xf32>, vector<64x256xf32>, vector<2x256xf32> -> vector<2x256xf32>
    %116 = arith.addf %114, %115 : vector<2x256xf32>
    %117 = math.tanh %116 : vector<2x256xf32>
    %118 = arith.negf %116 : vector<2x256xf32>
    %119 = math.exp %118 : vector<2x256xf32>
    %cst_50 = arith.constant 1.000000e+00 : f32
    %120 = vector.broadcast %cst_50 : f32 to vector<2x256xf32>
    %121 = arith.addf %120, %119 : vector<2x256xf32>
    %122 = arith.divf %120, %121 : vector<2x256xf32>
    %123 = arith.select %31, %117, %122 : vector<2x256xi1>, vector<2x256xf32>
    %124 = vector.extract_strided_slice %123 {offsets = [0, 0], sizes = [2, 64], strides = [1, 1]} : vector<2x256xf32> to vector<2x64xf32>
    %125 = vector.extract_strided_slice %123 {offsets = [0, 64], sizes = [2, 64], strides = [1, 1]} : vector<2x256xf32> to vector<2x64xf32>
    %126 = vector.extract_strided_slice %123 {offsets = [0, 128], sizes = [2, 64], strides = [1, 1]} : vector<2x256xf32> to vector<2x64xf32>
    %127 = vector.extract_strided_slice %123 {offsets = [0, 192], sizes = [2, 64], strides = [1, 1]} : vector<2x256xf32> to vector<2x64xf32>
    %128 = arith.mulf %125, %97 : vector<2x64xf32>
    %129 = arith.mulf %124, %126 : vector<2x64xf32>
    %130 = arith.addf %128, %129 : vector<2x64xf32>
    %131 = math.tanh %130 : vector<2x64xf32>
    %132 = arith.mulf %127, %131 : vector<2x64xf32>
    %c0_51 = arith.constant 0 : index
    %c3 = arith.constant 3 : index
    %133 = memref.load %arg0[%c0_51, %c3] : memref<2x8xi32, #tpu.memory_space<smem>>
    %134 = arith.index_cast %133 : i32 to index
    %c0_52 = arith.constant 0 : index
    %135 = vector.load %arg8[%134, %c0_52] : memref<50x256xf32, #tpu.memory_space<vmem>>, vector<1x256xf32>
    %c1_53 = arith.constant 1 : index
    %c3_54 = arith.constant 3 : index
    %136 = memref.load %arg0[%c1_53, %c3_54] : memref<2x8xi32, #tpu.memory_space<smem>>
    %137 = arith.index_cast %136 : i32 to index
    %c0_55 = arith.constant 0 : index
    %138 = vector.load %arg8[%137, %c0_55] : memref<50x256xf32, #tpu.memory_space<vmem>>, vector<1x256xf32>
    %c0_56 = arith.constant 0 : index
    %c4 = arith.constant 4 : index
    %139 = memref.load %arg0[%c0_56, %c4] : memref<2x8xi32, #tpu.memory_space<smem>>
    %140 = arith.index_cast %139 : i32 to index
    %c0_57 = arith.constant 0 : index
    %141 = vector.load %arg8[%140, %c0_57] : memref<50x256xf32, #tpu.memory_space<vmem>>, vector<1x256xf32>
    %c1_58 = arith.constant 1 : index
    %c4_59 = arith.constant 4 : index
    %142 = memref.load %arg0[%c1_58, %c4_59] : memref<2x8xi32, #tpu.memory_space<smem>>
    %143 = arith.index_cast %142 : i32 to index
    %c0_60 = arith.constant 0 : index
    %144 = vector.load %arg8[%143, %c0_60] : memref<50x256xf32, #tpu.memory_space<vmem>>, vector<1x256xf32>
    %145 = tpu.concatenate %135, %138 in 0 : vector<1x256xf32>, vector<1x256xf32> -> vector<2x256xf32>
    %146 = tpu.concatenate %141, %144 in 0 : vector<1x256xf32>, vector<1x256xf32> -> vector<2x256xf32>
    %147 = arith.select %26, %145, %146 : vector<2x256xi1>, vector<2x256xf32>
    %cst_61 = arith.constant dense<0.000000e+00> : vector<2x256xf32>
    %148 = tpu.matmul %132, %7, %cst_61 {dimension_numbers = #tpu.dot_dimension_numbers<[1], [0], [0], [1], [0, 0, 1, 1], [], []>} : vector<2x64xf32>, vector<64x256xf32>, vector<2x256xf32> -> vector<2x256xf32>
    %149 = arith.addf %147, %148 : vector<2x256xf32>
    %150 = math.tanh %149 : vector<2x256xf32>
    %151 = arith.negf %149 : vector<2x256xf32>
    %152 = math.exp %151 : vector<2x256xf32>
    %cst_62 = arith.constant 1.000000e+00 : f32
    %153 = vector.broadcast %cst_62 : f32 to vector<2x256xf32>
    %154 = arith.addf %153, %152 : vector<2x256xf32>
    %155 = arith.divf %153, %154 : vector<2x256xf32>
    %156 = arith.select %31, %150, %155 : vector<2x256xi1>, vector<2x256xf32>
    %157 = vector.extract_strided_slice %156 {offsets = [0, 0], sizes = [2, 64], strides = [1, 1]} : vector<2x256xf32> to vector<2x64xf32>
    %158 = vector.extract_strided_slice %156 {offsets = [0, 64], sizes = [2, 64], strides = [1, 1]} : vector<2x256xf32> to vector<2x64xf32>
    %159 = vector.extract_strided_slice %156 {offsets = [0, 128], sizes = [2, 64], strides = [1, 1]} : vector<2x256xf32> to vector<2x64xf32>
    %160 = vector.extract_strided_slice %156 {offsets = [0, 192], sizes = [2, 64], strides = [1, 1]} : vector<2x256xf32> to vector<2x64xf32>
    %161 = arith.mulf %158, %130 : vector<2x64xf32>
    %162 = arith.mulf %157, %159 : vector<2x64xf32>
    %163 = arith.addf %161, %162 : vector<2x64xf32>
    %164 = math.tanh %163 : vector<2x64xf32>
    %165 = arith.mulf %160, %164 : vector<2x64xf32>
    %c0_63 = arith.constant 0 : index
    %c4_64 = arith.constant 4 : index
    %166 = memref.load %arg0[%c0_63, %c4_64] : memref<2x8xi32, #tpu.memory_space<smem>>
    %167 = arith.index_cast %166 : i32 to index
    %c0_65 = arith.constant 0 : index
    %168 = vector.load %arg8[%167, %c0_65] : memref<50x256xf32, #tpu.memory_space<vmem>>, vector<1x256xf32>
    %c1_66 = arith.constant 1 : index
    %c4_67 = arith.constant 4 : index
    %169 = memref.load %arg0[%c1_66, %c4_67] : memref<2x8xi32, #tpu.memory_space<smem>>
    %170 = arith.index_cast %169 : i32 to index
    %c0_68 = arith.constant 0 : index
    %171 = vector.load %arg8[%170, %c0_68] : memref<50x256xf32, #tpu.memory_space<vmem>>, vector<1x256xf32>
    %c0_69 = arith.constant 0 : index
    %c3_70 = arith.constant 3 : index
    %172 = memref.load %arg0[%c0_69, %c3_70] : memref<2x8xi32, #tpu.memory_space<smem>>
    %173 = arith.index_cast %172 : i32 to index
    %c0_71 = arith.constant 0 : index
    %174 = vector.load %arg8[%173, %c0_71] : memref<50x256xf32, #tpu.memory_space<vmem>>, vector<1x256xf32>
    %c1_72 = arith.constant 1 : index
    %c3_73 = arith.constant 3 : index
    %175 = memref.load %arg0[%c1_72, %c3_73] : memref<2x8xi32, #tpu.memory_space<smem>>
    %176 = arith.index_cast %175 : i32 to index
    %c0_74 = arith.constant 0 : index
    %177 = vector.load %arg8[%176, %c0_74] : memref<50x256xf32, #tpu.memory_space<vmem>>, vector<1x256xf32>
    %178 = tpu.concatenate %168, %171 in 0 : vector<1x256xf32>, vector<1x256xf32> -> vector<2x256xf32>
    %179 = tpu.concatenate %174, %177 in 0 : vector<1x256xf32>, vector<1x256xf32> -> vector<2x256xf32>
    %180 = arith.select %26, %178, %179 : vector<2x256xi1>, vector<2x256xf32>
    %cst_75 = arith.constant dense<0.000000e+00> : vector<2x256xf32>
    %181 = tpu.matmul %165, %7, %cst_75 {dimension_numbers = #tpu.dot_dimension_numbers<[1], [0], [0], [1], [0, 0, 1, 1], [], []>} : vector<2x64xf32>, vector<64x256xf32>, vector<2x256xf32> -> vector<2x256xf32>
    %182 = arith.addf %180, %181 : vector<2x256xf32>
    %183 = math.tanh %182 : vector<2x256xf32>
    %184 = arith.negf %182 : vector<2x256xf32>
    %185 = math.exp %184 : vector<2x256xf32>
    %cst_76 = arith.constant 1.000000e+00 : f32
    %186 = vector.broadcast %cst_76 : f32 to vector<2x256xf32>
    %187 = arith.addf %186, %185 : vector<2x256xf32>
    %188 = arith.divf %186, %187 : vector<2x256xf32>
    %189 = arith.select %31, %183, %188 : vector<2x256xi1>, vector<2x256xf32>
    %190 = vector.extract_strided_slice %189 {offsets = [0, 0], sizes = [2, 64], strides = [1, 1]} : vector<2x256xf32> to vector<2x64xf32>
    %191 = vector.extract_strided_slice %189 {offsets = [0, 64], sizes = [2, 64], strides = [1, 1]} : vector<2x256xf32> to vector<2x64xf32>
    %192 = vector.extract_strided_slice %189 {offsets = [0, 128], sizes = [2, 64], strides = [1, 1]} : vector<2x256xf32> to vector<2x64xf32>
    %193 = vector.extract_strided_slice %189 {offsets = [0, 192], sizes = [2, 64], strides = [1, 1]} : vector<2x256xf32> to vector<2x64xf32>
    %194 = arith.mulf %191, %163 : vector<2x64xf32>
    %195 = arith.mulf %190, %192 : vector<2x64xf32>
    %196 = arith.addf %194, %195 : vector<2x64xf32>
    %197 = math.tanh %196 : vector<2x64xf32>
    %198 = arith.mulf %193, %197 : vector<2x64xf32>
    %c0_77 = arith.constant 0 : index
    %c5_78 = arith.constant 5 : index
    %199 = memref.load %arg0[%c0_77, %c5_78] : memref<2x8xi32, #tpu.memory_space<smem>>
    %200 = arith.index_cast %199 : i32 to index
    %c0_79 = arith.constant 0 : index
    %201 = vector.load %arg8[%200, %c0_79] : memref<50x256xf32, #tpu.memory_space<vmem>>, vector<1x256xf32>
    %c1_80 = arith.constant 1 : index
    %c5_81 = arith.constant 5 : index
    %202 = memref.load %arg0[%c1_80, %c5_81] : memref<2x8xi32, #tpu.memory_space<smem>>
    %203 = arith.index_cast %202 : i32 to index
    %c0_82 = arith.constant 0 : index
    %204 = vector.load %arg8[%203, %c0_82] : memref<50x256xf32, #tpu.memory_space<vmem>>, vector<1x256xf32>
    %c0_83 = arith.constant 0 : index
    %c2_84 = arith.constant 2 : index
    %205 = memref.load %arg0[%c0_83, %c2_84] : memref<2x8xi32, #tpu.memory_space<smem>>
    %206 = arith.index_cast %205 : i32 to index
    %c0_85 = arith.constant 0 : index
    %207 = vector.load %arg8[%206, %c0_85] : memref<50x256xf32, #tpu.memory_space<vmem>>, vector<1x256xf32>
    %c1_86 = arith.constant 1 : index
    %c2_87 = arith.constant 2 : index
    %208 = memref.load %arg0[%c1_86, %c2_87] : memref<2x8xi32, #tpu.memory_space<smem>>
    %209 = arith.index_cast %208 : i32 to index
    %c0_88 = arith.constant 0 : index
    %210 = vector.load %arg8[%209, %c0_88] : memref<50x256xf32, #tpu.memory_space<vmem>>, vector<1x256xf32>
    %211 = tpu.concatenate %201, %204 in 0 : vector<1x256xf32>, vector<1x256xf32> -> vector<2x256xf32>
    %212 = tpu.concatenate %207, %210 in 0 : vector<1x256xf32>, vector<1x256xf32> -> vector<2x256xf32>
    %213 = arith.select %26, %211, %212 : vector<2x256xi1>, vector<2x256xf32>
    %cst_89 = arith.constant dense<0.000000e+00> : vector<2x256xf32>
    %214 = tpu.matmul %198, %7, %cst_89 {dimension_numbers = #tpu.dot_dimension_numbers<[1], [0], [0], [1], [0, 0, 1, 1], [], []>} : vector<2x64xf32>, vector<64x256xf32>, vector<2x256xf32> -> vector<2x256xf32>
    %215 = arith.addf %213, %214 : vector<2x256xf32>
    %216 = math.tanh %215 : vector<2x256xf32>
    %217 = arith.negf %215 : vector<2x256xf32>
    %218 = math.exp %217 : vector<2x256xf32>
    %cst_90 = arith.constant 1.000000e+00 : f32
    %219 = vector.broadcast %cst_90 : f32 to vector<2x256xf32>
    %220 = arith.addf %219, %218 : vector<2x256xf32>
    %221 = arith.divf %219, %220 : vector<2x256xf32>
    %222 = arith.select %31, %216, %221 : vector<2x256xi1>, vector<2x256xf32>
    %223 = vector.extract_strided_slice %222 {offsets = [0, 0], sizes = [2, 64], strides = [1, 1]} : vector<2x256xf32> to vector<2x64xf32>
    %224 = vector.extract_strided_slice %222 {offsets = [0, 64], sizes = [2, 64], strides = [1, 1]} : vector<2x256xf32> to vector<2x64xf32>
    %225 = vector.extract_strided_slice %222 {offsets = [0, 128], sizes = [2, 64], strides = [1, 1]} : vector<2x256xf32> to vector<2x64xf32>
    %226 = vector.extract_strided_slice %222 {offsets = [0, 192], sizes = [2, 64], strides = [1, 1]} : vector<2x256xf32> to vector<2x64xf32>
    %227 = arith.mulf %224, %196 : vector<2x64xf32>
    %228 = arith.mulf %223, %225 : vector<2x64xf32>
    %229 = arith.addf %227, %228 : vector<2x64xf32>
    %230 = math.tanh %229 : vector<2x64xf32>
    %231 = arith.mulf %226, %230 : vector<2x64xf32>
    %c0_91 = arith.constant 0 : index
    %c6_92 = arith.constant 6 : index
    %232 = memref.load %arg0[%c0_91, %c6_92] : memref<2x8xi32, #tpu.memory_space<smem>>
    %233 = arith.index_cast %232 : i32 to index
    %c0_93 = arith.constant 0 : index
    %234 = vector.load %arg8[%233, %c0_93] : memref<50x256xf32, #tpu.memory_space<vmem>>, vector<1x256xf32>
    %c1_94 = arith.constant 1 : index
    %c6_95 = arith.constant 6 : index
    %235 = memref.load %arg0[%c1_94, %c6_95] : memref<2x8xi32, #tpu.memory_space<smem>>
    %236 = arith.index_cast %235 : i32 to index
    %c0_96 = arith.constant 0 : index
    %237 = vector.load %arg8[%236, %c0_96] : memref<50x256xf32, #tpu.memory_space<vmem>>, vector<1x256xf32>
    %c0_97 = arith.constant 0 : index
    %c1_98 = arith.constant 1 : index
    %238 = memref.load %arg0[%c0_97, %c1_98] : memref<2x8xi32, #tpu.memory_space<smem>>
    %239 = arith.index_cast %238 : i32 to index
    %c0_99 = arith.constant 0 : index
    %240 = vector.load %arg8[%239, %c0_99] : memref<50x256xf32, #tpu.memory_space<vmem>>, vector<1x256xf32>
    %c1_100 = arith.constant 1 : index
    %c1_101 = arith.constant 1 : index
    %241 = memref.load %arg0[%c1_100, %c1_101] : memref<2x8xi32, #tpu.memory_space<smem>>
    %242 = arith.index_cast %241 : i32 to index
    %c0_102 = arith.constant 0 : index
    %243 = vector.load %arg8[%242, %c0_102] : memref<50x256xf32, #tpu.memory_space<vmem>>, vector<1x256xf32>
    %244 = tpu.concatenate %234, %237 in 0 : vector<1x256xf32>, vector<1x256xf32> -> vector<2x256xf32>
    %245 = tpu.concatenate %240, %243 in 0 : vector<1x256xf32>, vector<1x256xf32> -> vector<2x256xf32>
    %246 = arith.select %26, %244, %245 : vector<2x256xi1>, vector<2x256xf32>
    %cst_103 = arith.constant dense<0.000000e+00> : vector<2x256xf32>
    %247 = tpu.matmul %231, %7, %cst_103 {dimension_numbers = #tpu.dot_dimension_numbers<[1], [0], [0], [1], [0, 0, 1, 1], [], []>} : vector<2x64xf32>, vector<64x256xf32>, vector<2x256xf32> -> vector<2x256xf32>
    %248 = arith.addf %246, %247 : vector<2x256xf32>
    %249 = math.tanh %248 : vector<2x256xf32>
    %250 = arith.negf %248 : vector<2x256xf32>
    %251 = math.exp %250 : vector<2x256xf32>
    %cst_104 = arith.constant 1.000000e+00 : f32
    %252 = vector.broadcast %cst_104 : f32 to vector<2x256xf32>
    %253 = arith.addf %252, %251 : vector<2x256xf32>
    %254 = arith.divf %252, %253 : vector<2x256xf32>
    %255 = arith.select %31, %249, %254 : vector<2x256xi1>, vector<2x256xf32>
    %256 = vector.extract_strided_slice %255 {offsets = [0, 0], sizes = [2, 64], strides = [1, 1]} : vector<2x256xf32> to vector<2x64xf32>
    %257 = vector.extract_strided_slice %255 {offsets = [0, 64], sizes = [2, 64], strides = [1, 1]} : vector<2x256xf32> to vector<2x64xf32>
    %258 = vector.extract_strided_slice %255 {offsets = [0, 128], sizes = [2, 64], strides = [1, 1]} : vector<2x256xf32> to vector<2x64xf32>
    %259 = vector.extract_strided_slice %255 {offsets = [0, 192], sizes = [2, 64], strides = [1, 1]} : vector<2x256xf32> to vector<2x64xf32>
    %260 = arith.mulf %257, %229 : vector<2x64xf32>
    %261 = arith.mulf %256, %258 : vector<2x64xf32>
    %262 = arith.addf %260, %261 : vector<2x64xf32>
    %263 = math.tanh %262 : vector<2x64xf32>
    %264 = arith.mulf %259, %263 : vector<2x64xf32>
    %c0_105 = arith.constant 0 : index
    %c7_106 = arith.constant 7 : index
    %265 = memref.load %arg0[%c0_105, %c7_106] : memref<2x8xi32, #tpu.memory_space<smem>>
    %266 = arith.index_cast %265 : i32 to index
    %c0_107 = arith.constant 0 : index
    %267 = vector.load %arg8[%266, %c0_107] : memref<50x256xf32, #tpu.memory_space<vmem>>, vector<1x256xf32>
    %c1_108 = arith.constant 1 : index
    %c7_109 = arith.constant 7 : index
    %268 = memref.load %arg0[%c1_108, %c7_109] : memref<2x8xi32, #tpu.memory_space<smem>>
    %269 = arith.index_cast %268 : i32 to index
    %c0_110 = arith.constant 0 : index
    %270 = vector.load %arg8[%269, %c0_110] : memref<50x256xf32, #tpu.memory_space<vmem>>, vector<1x256xf32>
    %c0_111 = arith.constant 0 : index
    %c0_112 = arith.constant 0 : index
    %271 = memref.load %arg0[%c0_111, %c0_112] : memref<2x8xi32, #tpu.memory_space<smem>>
    %272 = arith.index_cast %271 : i32 to index
    %c0_113 = arith.constant 0 : index
    %273 = vector.load %arg8[%272, %c0_113] : memref<50x256xf32, #tpu.memory_space<vmem>>, vector<1x256xf32>
    %c1_114 = arith.constant 1 : index
    %c0_115 = arith.constant 0 : index
    %274 = memref.load %arg0[%c1_114, %c0_115] : memref<2x8xi32, #tpu.memory_space<smem>>
    %275 = arith.index_cast %274 : i32 to index
    %c0_116 = arith.constant 0 : index
    %276 = vector.load %arg8[%275, %c0_116] : memref<50x256xf32, #tpu.memory_space<vmem>>, vector<1x256xf32>
    %277 = tpu.concatenate %267, %270 in 0 : vector<1x256xf32>, vector<1x256xf32> -> vector<2x256xf32>
    %278 = tpu.concatenate %273, %276 in 0 : vector<1x256xf32>, vector<1x256xf32> -> vector<2x256xf32>
    %279 = arith.select %26, %277, %278 : vector<2x256xi1>, vector<2x256xf32>
    %cst_117 = arith.constant dense<0.000000e+00> : vector<2x256xf32>
    %280 = tpu.matmul %264, %7, %cst_117 {dimension_numbers = #tpu.dot_dimension_numbers<[1], [0], [0], [1], [0, 0, 1, 1], [], []>} : vector<2x64xf32>, vector<64x256xf32>, vector<2x256xf32> -> vector<2x256xf32>
    %281 = arith.addf %279, %280 : vector<2x256xf32>
    %282 = math.tanh %281 : vector<2x256xf32>
    %283 = arith.negf %281 : vector<2x256xf32>
    %284 = math.exp %283 : vector<2x256xf32>
    %cst_118 = arith.constant 1.000000e+00 : f32
    %285 = vector.broadcast %cst_118 : f32 to vector<2x256xf32>
    %286 = arith.addf %285, %284 : vector<2x256xf32>
    %287 = arith.divf %285, %286 : vector<2x256xf32>
    %288 = arith.select %31, %282, %287 : vector<2x256xi1>, vector<2x256xf32>
    %289 = vector.extract_strided_slice %288 {offsets = [0, 0], sizes = [2, 64], strides = [1, 1]} : vector<2x256xf32> to vector<2x64xf32>
    %290 = vector.extract_strided_slice %288 {offsets = [0, 64], sizes = [2, 64], strides = [1, 1]} : vector<2x256xf32> to vector<2x64xf32>
    %291 = vector.extract_strided_slice %288 {offsets = [0, 128], sizes = [2, 64], strides = [1, 1]} : vector<2x256xf32> to vector<2x64xf32>
    %292 = vector.extract_strided_slice %288 {offsets = [0, 192], sizes = [2, 64], strides = [1, 1]} : vector<2x256xf32> to vector<2x64xf32>
    %293 = arith.mulf %290, %262 : vector<2x64xf32>
    %294 = arith.mulf %289, %291 : vector<2x64xf32>
    %295 = arith.addf %293, %294 : vector<2x64xf32>
    %296 = math.tanh %295 : vector<2x64xf32>
    %297 = arith.mulf %292, %296 : vector<2x64xf32>
    %c0_119 = arith.constant 0 : index
    %c0_120 = arith.constant 0 : index
    %298 = vector.load %arg5[%c0_119, %c0_120] : memref<64x128xf32, #tpu.memory_space<vmem>>, vector<64x128xf32>
    %cst_121 = arith.constant dense<0.000000e+00> : vector<2x128xf32>
    %299 = tpu.matmul %297, %298, %cst_121 {dimension_numbers = #tpu.dot_dimension_numbers<[1], [0], [0], [1], [0, 0, 1, 1], [], []>} : vector<2x64xf32>, vector<64x128xf32>, vector<2x128xf32> -> vector<2x128xf32>
    %c0_122 = arith.constant 0 : index
    %c0_123 = arith.constant 0 : index
    %300 = vector.load %arg6[%c0_122, %c0_123] : memref<1x128xf32, #tpu.memory_space<vmem>>, vector<1x128xf32>
    %301 = vector.broadcast %300 : vector<1x128xf32> to vector<2x128xf32>
    %302 = arith.addf %299, %301 : vector<2x128xf32>
    %c0_124 = arith.constant 0 : index
    %c0_125 = arith.constant 0 : index
    %303 = vector.load %arg7[%c0_124, %c0_125] : memref<2x128xf32, #tpu.memory_space<vmem>>, vector<2x128xf32>
    tpu.vector_store %arg7[%c0_124, %c0_125], %302 {strides = array<i32>} : memref<2x128xf32, #tpu.memory_space<vmem>>, vector<2x128xf32>,
    return
  }
}

</mosaic_0001>

<bundles_post_ra>
// kernel: tpu_custom_call.1
= control target key start
LH: loop header
LB: loop body
LE: loop exit
PB: predicated region body
PF: predicated region fallthrough
CT: control target
= control target key end

     0   :  { %12 = vsyncpa [#allocation6], 0  ;;  %s2913_s0 = inlined_call_operand.hbm [shape: s32[2,8], index: 0, kind: input, shape index: {}]   ;;  %s2914_s1 = inlined_call_operand.hbm [shape: f32[50,201], index: 1, kind: input, shape index: {}]   ;;  %s2915_s2 = inlined_call_operand.hbm [shape: f32[201,256], index: 2, kind: input, shape index: {}]   ;;  %s2916_s3 = inlined_call_operand.vmem [shape: f32[1,256], index: 3, kind: input, shape index: {}]   ;;  %s2917_s4 = inlined_call_operand.hbm [shape: f32[64,256], index: 4, kind: input, shape index: {}]   ;;  %s2918_s5 = inlined_call_operand.hbm [shape: f32[64,128], index: 5, kind: input, shape index: {}]   ;;  %s2919_s6 = inlined_call_operand.vmem [shape: f32[1,128], index: 6, kind: input, shape index: {}]   ;;  %s2920_s7 = inlined_call_operand.hbm [shape: f32[2,128], index: 7, kind: output, shape index: {}]  }
   0x1   :  { %13 = vsyncpa [#allocation4], 0 }
   0x2   :  { %14 = vsyncpa [#allocation9], 0 }
   0x3   :  { %15 = vsyncpa [#allocation12], 0 }
   0x4   :  { %16 = vsyncpa [#allocation5], 0  ;;  %s2280_s24 = smov [#allocation8]   ;;  %s2281_s26 = smov [#allocation7]  }
   0x5   :  { %s42_s25 = sshll.u32 %s2280_s24, 4  ;;  %s30_s27 = sshll.u32 %s2281_s26, 4  ;;  %s43_s25 = int_to_ptr.vmem [resolvable:$true] %s42_s25  ;;  %s31_s27 = int_to_ptr.vmem [resolvable:$true] %s30_s27 }
   0x6   :  { %s2150_s30 = scalar_lea.hbm %s2915_s2, 6656 }
   0x7   :  { %p2151_p0 = scmp.ne.s32.totalorder %s2915_s2, %s2150_s30  ;;  %p2154_p1 = scmp.lt.u32.totalorder %s2150_s30, %s2915_s2 }
   0x9   :  { %p2156_p2 = pnand %p2154_p1, %p2151_p0 }
   0xb   :  { %2159 = shalt.err (!%p2156_p2)
}
   0xc   :  { %s2160_s12 = scalar_lea.vmem %s43_s25, 6656  ;;  %p2165_p4 = scmp.lt.s32.totalorder %s43_s25, %s43_s25 }
   0xd   :  { %p2161_p3 = scmp.ne.s32.totalorder %s43_s25, %s2160_s12  ;;  %p2166_p5 = scmp.lt.s32.totalorder %s2160_s12, %s2160_s12 }
   0xf   :  { %p2167_p6 = por %p2166_p5, %p2165_p4 }
  0x11   :  { %p2168_p7 = pnand %p2167_p6, %p2161_p3 }
  0x13   :  { %2171 = shalt.err (!%p2168_p7)
}
  0x14   :  { %s2282_s13 = smov 256   ;;  %s2283_s14 = smov 16  }
  0x15   :  { %48 = dma.hbm_to_vmem [thread:$0]  %s2915_s2, 6656, %s43_s25, [#allocation9], %s2282_s13, %s2282_s13, %s2283_s14  }
  0x16   :  { %s2172_s19 = scalar_lea.hbm %s2913_s0, 32 }
  0x17   :  { %p2173_p8 = scmp.ne.s32.totalorder %s2913_s0, %s2172_s19  ;;  %p2176_p9 = scmp.lt.u32.totalorder %s2172_s19, %s2913_s0 }
  0x19   :  { %p2178_p10 = pnand %p2176_p9, %p2173_p8 }
  0x1b   :  { %2181 = shalt.err (!%p2178_p10)
}
  0x1c   :  { %s2284_s24 = smov [#allocation3]   ;;  %s2182_s29 = scalar_lea.hbm %s2914_s1, 1792 }
  0x1d   :  { %24 = dma.hbm_to_smem %s2913_s0, 32, %s2284_s24, [#allocation6]  }
  0x1e   :  { %p2183_p11 = scmp.ne.s32.totalorder %s2914_s1, %s2182_s29  ;;  %p2186_p12 = scmp.lt.u32.totalorder %s2182_s29, %s2914_s1 }
  0x20   :  { %p2188_p13 = pnand %p2186_p12, %p2183_p11 }
  0x22   :  { %2191 = shalt.err (!%p2188_p13)
}
  0x23   :  { %s2192_s11 = scalar_lea.vmem %s31_s27, 1792  ;;  %p2197_p1 = scmp.lt.s32.totalorder %s31_s27, %s31_s27 }
  0x24   :  { %p2193_p0 = scmp.ne.s32.totalorder %s31_s27, %s2192_s11  ;;  %p2198_p2 = scmp.lt.s32.totalorder %s2192_s11, %s2192_s11 }
  0x26   :  { %p2199_p3 = por %p2198_p2, %p2197_p1 }
  0x28   :  { %p2200_p4 = pnand %p2199_p3, %p2193_p0 }
  0x2a   :  { %2203 = shalt.err (!%p2200_p4)
}
  0x2b   :  { %36 = dma.hbm_to_vmem [thread:$0]  %s2914_s1, 1792, %s31_s27, [#allocation4], %s2282_s13, %s2282_s13, %s2283_s14  }
  0x2c   :  { %s2285_s15 = smov [#allocation10]   ;;  %s2286_s17 = smov [#allocation11]  }
  0x2d   :  { %s56_s16 = sshll.u32 %s2285_s15, 4  ;;  %s68_s18 = sshll.u32 %s2286_s17, 4  ;;  %s57_s16 = int_to_ptr.vmem [resolvable:$true] %s56_s16  ;;  %s69_s18 = int_to_ptr.vmem [resolvable:$true] %s68_s18 }
  0x2e   :  { %s2204_s21 = scalar_lea.hbm %s2917_s4, 2048 }
  0x2f   :  { %p2205_p5 = scmp.ne.s32.totalorder %s2917_s4, %s2204_s21  ;;  %p2208_p6 = scmp.lt.u32.totalorder %s2204_s21, %s2917_s4 }
  0x31   :  { %p2210_p7 = pnand %p2208_p6, %p2205_p5 }
  0x33   :  { %2213 = shalt.err (!%p2210_p7)
}
  0x34   :  { %s2214_s1 = scalar_lea.vmem %s57_s16, 2048  ;;  %p2219_p9 = scmp.lt.s32.totalorder %s57_s16, %s57_s16 }
  0x35   :  { %p2215_p8 = scmp.ne.s32.totalorder %s57_s16, %s2214_s1  ;;  %p2220_p10 = scmp.lt.s32.totalorder %s2214_s1, %s2214_s1 }
  0x37   :  { %p2221_p11 = por %p2220_p10, %p2219_p9 }
  0x39   :  { %p2222_p12 = pnand %p2221_p11, %p2215_p8 }
  0x3b   :  { %2225 = shalt.err (!%p2222_p12)
}
  0x3c   :  { %62 = dma.hbm_to_vmem [thread:$0]  %s2917_s4, 2048, %s57_s16, [#allocation9], %s2282_s13, %s2282_s13, %s2283_s14  }
  0x3d   :  { %s2226_s29 = scalar_lea.hbm %s2918_s5, 1024 }
  0x3e   :  { %p2227_p13 = scmp.ne.s32.totalorder %s2918_s5, %s2226_s29  ;;  %p2230_p0 = scmp.lt.u32.totalorder %s2226_s29, %s2918_s5 }
  0x40   :  { %p2232_p1 = pnand %p2230_p0, %p2227_p13 }
  0x42   :  { %2235 = shalt.err (!%p2232_p1)
}
  0x43   :  { %s2236_s11 = scalar_lea.vmem %s69_s18, 1024  ;;  %p2241_p3 = scmp.lt.s32.totalorder %s69_s18, %s69_s18 }
  0x44   :  { %p2237_p2 = scmp.ne.s32.totalorder %s69_s18, %s2236_s11  ;;  %p2242_p4 = scmp.lt.s32.totalorder %s2236_s11, %s2236_s11 }
  0x46   :  { %p2243_p5 = por %p2242_p4, %p2241_p3 }
  0x48   :  { %p2244_p6 = pnand %p2243_p5, %p2237_p2 }
  0x4a   :  { %2247 = shalt.err (!%p2244_p6)
}
  0x4b   :  { %s2287_s4 = smov 128   ;;  %s2288_s13 = smov 8  }
  0x4c   :  { %74 = dma.hbm_to_vmem [thread:$0]  %s2918_s5, 1024, %s69_s18, [#allocation12], %s2287_s4, %s2287_s4, %s2288_s13  }
  0x4d   :  { %2270 = dma.done.wait [#allocation6], 32  }
  0x4e   :  { %2271 = vsyncadd [#allocation6], 4294967264 }
  0x4f   :  { %2272 = dma.done.wait [#allocation4], 1792  }
  0x50   :  { %2273 = vsyncadd [#allocation4], 4294965504 }
  0x51   :  { %2274 = dma.done.wait [#allocation9], 8704  }
  0x52   :  { %2275 = vsyncadd [#allocation9], 4294958592 }
  0x53   :  { %2276 = dma.done.wait [#allocation12], 1024  }
  0x54   :  { %2277 = vsyncadd [#allocation12], 4294966272 }
  0x55   :  { %92 = sfence }
  0x56   :  { %v108_v0 = vld [vmem:[#allocation8 + $0x8] sm:$0xff]  ;;  %v110_v1 = vld [vmem:[#allocation8 + $0x18] sm:$0xff]  ;;  %v107_v2 = vld [vmem:[#allocation8] sm:$0xff]  ;;  %v2289_v12 = vmov 0.0   ;;  %vm171_vm0 = vcmask 596992   ;;  %vm193_vm1 = vcmask 1040384  }
  0x57   :  { %v1845_v3 = vpack.c.bf16 %v110_v1, %v108_v0  ;;  %v109_v4 = vld [vmem:[#allocation8 + $0x10] sm:$0xff]  ;;  %v112_v5 = vld [vmem:[#allocation8 + $0x28] sm:$0xff]  ;;  %v114_v6 = vld [vmem:[#allocation8 + $0x38] sm:$0xff]  ;;  %530 = vmatprep.mubr.f32.mxu1 %v2289_v12  ;;  %vm2290_vm2 = vmmov 1   ;;  %s372_s5 = sld [smem:[#allocation3]]  ;;  %s2463_s16 = sld [smem:[#allocation3 + $0x7]] }
  0x58   :  { %v1847_v7 = vpack.c.bf16 %v109_v4, %v107_v2  ;;  %v1849_v8 = vpack.c.bf16 %v114_v6, %v112_v5  ;;  %v111_v9 = vld [vmem:[#allocation8 + $0x20] sm:$0xff]  ;;  %v113_v10 = vld [vmem:[#allocation8 + $0x30] sm:$0xff]  ;;  %v116_v11 = vld [vmem:[#allocation8 + $0x48] sm:$0xff]  ;;  %s1731_s12 = sld [smem:[#allocation3 + $0x80]]  ;;  %s2465_s18 = sld [smem:[#allocation3 + $0x87]]  ;;  %vm462_vm7 = vcmask 523264  }
  0x59   :  { %1846 = vmatprep.subr.bf16.mxu0 %v1845_v3  ;;  %v118_v13 = vld [vmem:[#allocation8 + $0x58] sm:$0xff]  ;;  %v1851_v14 = vpack.c.bf16 %v113_v10, %v111_v9  ;;  %v115_v16 = vld [vmem:[#allocation8 + $0x40] sm:$0xff]  ;;  %v117_v17 = vld [vmem:[#allocation8 + $0x50] sm:$0xff]  ;;  %s2467_s19 = sld [smem:[#allocation3 + $0x1]]  ;;  %s2488_s2 = sld [smem:[#allocation3 + $0x6]]  ;;  %vm2293_vm8 = vmmov 0  }
  0x5a   :  { %1848 = vmatpush1.bf16.msra.mxu0 %v1847_v7  ;;  %v1853_v15 = vpack.c.bf16 %v118_v13, %v116_v11  ;;  %v120_v18 = vld [vmem:[#allocation8 + $0x68] sm:$0xff]  ;;  %v122_v19 = vld [vmem:[#allocation8 + $0x78] sm:$0xff]  ;;  %v1855_v20 = vpack.c.bf16 %v117_v17, %v115_v16  ;;  %v119_v22 = vld [vmem:[#allocation8 + $0x60] sm:$0xff]  ;;  %s2469_s20 = sld [smem:[#allocation3 + $0x81]]  ;;  %s2519_s23 = sld [smem:[#allocation3 + $0x82]] }
  0x5b   :  { %1850 = vmatprep.subr.bf16.mxu0 %v1849_v8  ;;  %v1857_v21 = vpack.c.bf16 %v122_v19, %v120_v18  ;;  %v121_v23 = vld [vmem:[#allocation8 + $0x70] sm:$0xff]  ;;  %v124_v24 = vld [vmem:[#allocation8 + $0x88] sm:$0xff]  ;;  %v126_v25 = vld [vmem:[#allocation8 + $0x98] sm:$0xff] }
  0x5c   :  { %v1859_v26 = vpack.c.bf16 %v121_v23, %v119_v22  ;;  %v1861_v27 = vpack.c.bf16 %v126_v25, %v124_v24  ;;  %v123_v28 = vld [vmem:[#allocation8 + $0x80] sm:$0xff]  ;;  %v125_v29 = vld [vmem:[#allocation8 + $0x90] sm:$0xff]  ;;  %v128_v30 = vld [vmem:[#allocation8 + $0xa8] sm:$0xff] }
  0x5d   :  { %v130_v31 = vld [vmem:[#allocation8 + $0xb8] sm:$0xff]  ;;  %v1863_v32 = vpack.c.bf16 %v125_v29, %v123_v28  ;;  %v127_v34 = vld [vmem:[#allocation8 + $0xa0] sm:$0xff]  ;;  %v129_v35 = vld [vmem:[#allocation8 + $0xb0] sm:$0xff]  ;;  %s373_s15 = sshra.s32 %s372_s5, 3  ;;  %s376_s21 = sand.u32 7, %s372_s5 }
  0x5e   :  { %1852 = vmatpush1.bf16.msra.mxu0 %v1851_v14  ;;  %v1865_v33 = vpack.c.bf16 %v130_v31, %v128_v30  ;;  %v94_v36 = vld [vmem:[#allocation7 + $0x8] sm:$0xff]  ;;  %v132_v37 = vld [vmem:[#allocation8 + $0xc8] sm:$0xff]  ;;  %v1867_v39 = vpack.c.bf16 %v129_v35, %v127_v34  ;;  %v131_v40 = vld [vmem:[#allocation8 + $0xc0] sm:$0xff]  ;;  %s383_s17 = sshra.s32 %s1731_s12, 3  ;;  %s1801_s22 = sshll.u32 %s373_s15, 4 }
  0x5f   :  { %1854 = vmatprep.subr.bf16.mxu0 %v1853_v15  ;;  %v134_v38 = vld [vmem:[#allocation8 + $0xd8] sm:$0xff]  ;;  %1722 = vmatprep.mubr.msk.f32.mxu0 %vm171_vm0, %v94_v36  ;;  %v133_v41 = vld [vmem:[#allocation8 + $0xd0] sm:$0xff]  ;;  %v136_v43 = vld [vmem:[#allocation8 + $0xe8] sm:$0xff]  ;;  %s386_s26 = sand.u32 7, %s1731_s12  ;;  %s1802_s1 = sshll.u32 %s383_s17, 4 }
  0x60   :  { %v1869_v42 = vpack.c.bf16 %v134_v38, %v132_v37  ;;  %v138_v44 = vld [vmem:[#allocation8 + $0xf8] sm:$0xff]  ;;  %v322_v45 = vld [vmem:[#allocation10 + $0x8] sm:$0xff]  ;;  %v321_v47 = vld [vmem:[#allocation10] sm:$0xff]  ;;  %v1871_v53 = vpack.c.bf16 %v133_v41, %v131_v40  ;;  %s2478_s27 = sadd.s32 %s1801_s22, %s376_s21  ;;  %s2483_s28 = sadd.s32 %s1802_s1, %s386_s26 }
  0x61   :  { %v324_v46 = vld [vmem:[#allocation10 + $0x18] sm:$0xff]  ;;  %v323_v48 = vld [vmem:[#allocation10 + $0x10] sm:$0xff]  ;;  %v135_v49 = vld [vmem:[#allocation8 + $0xe0] sm:$0xff]  ;;  %v1873_v57 = vpack.c.bf16 %v138_v44, %v136_v43  ;;  %s393_s25 = sshra.s32 %s2463_s16, 3  ;;  %s403_s29 = sshra.s32 %s2465_s18, 3 }
  0x62   :  { %1856 = vmatpush1.bf16.msra.mxu0 %v1855_v20  ;;  %v2406_v50 = vpack.c.bf16 %v324_v46, %v322_v45  ;;  %v2408_v51 = vpack.c.bf16 %v323_v48, %v321_v47  ;;  %v326_v52 = vld [vmem:[#allocation10 + $0x28] sm:$0xff]  ;;  %v328_v54 = vld [vmem:[#allocation10 + $0x38] sm:$0xff]  ;;  %v325_v55 = vld [vmem:[#allocation10 + $0x20] sm:$0xff]  ;;  %s396_s30 = sand.u32 7, %s2463_s16  ;;  %s565_s8 = sshra.s32 %s2467_s19, 3 }
  0x63   :  { %1858 = vmatprep.subr.bf16.mxu0 %v1857_v21  ;;  %v327_v56 = vld [vmem:[#allocation10 + $0x30] sm:$0xff]  ;;  %v2411_v59 = vpack.c.bf16 %v328_v54, %v326_v52  ;;  %v330_v60 = vld [vmem:[#allocation10 + $0x48] sm:$0xff]  ;;  %v332_v61 = vld [vmem:[#allocation10 + $0x58] sm:$0xff]  ;;  %s1803_s9 = sshll.u32 %s393_s25, 4  ;;  %s575_s10 = sshra.s32 %s2469_s20, 3 }
  0x64   :  { %v137_v58 = vld [vmem:[#allocation8 + $0xf0] sm:$0xff]  ;;  %1900 = vmatprep.subr.bf16.mxu1 %v2406_v50  ;;  %v140_v62 = vld [vmem:[#allocation8 + $0x108] sm:$0xff]  ;;  %v142_v63 = vld [vmem:[#allocation8 + $0x118] sm:$0xff]  ;;  %v2414_v0 = vpack.c.bf16 %v327_v56, %v325_v55  ;;  %v2417_v1 = vpack.c.bf16 %v332_v61, %v330_v60  ;;  %v161_v56 = vlaneseq  ;;  %s406_s11 = sand.u32 7, %s2465_s18  ;;  %s1804_s4 = sshll.u32 %s403_s29, 4 }
  0x65   :  { %1902 = vmatpush1.bf16.msra.mxu1 %v2408_v51  ;;  %v329_v2 = vld [vmem:[#allocation10 + $0x40] sm:$0xff]  ;;  %v331_v3 = vld [vmem:[#allocation10 + $0x50] sm:$0xff]  ;;  %v1875_v4 = vpack.c.bf16 %v137_v58, %v135_v49  ;;  %v334_v5 = vld [vmem:[#allocation10 + $0x68] sm:$0xff]  ;;  %v1877_v7 = vpack.c.bf16 %v142_v63, %v140_v62  ;;  %s568_s13 = sand.u32 7, %s2467_s19  ;;  %s1805_s14 = sshll.u32 %s565_s8, 4 }
  0x66   :  { %1860 = vmatpush1.bf16.msra.mxu0 %v1859_v26  ;;  %1904 = vmatprep.subr.bf16.mxu1 %v2411_v59  ;;  %v336_v6 = vld [vmem:[#allocation10 + $0x78] sm:$0xff]  ;;  %v139_v8 = vld [vmem:[#allocation8 + $0x100] sm:$0xff]  ;;  %v141_v9 = vld [vmem:[#allocation8 + $0x110] sm:$0xff]  ;;  %v2420_v13 = vpack.c.bf16 %v331_v3, %v329_v2  ;;  %v162_v60 = vshrl.u32 %v161_v56, 7  ;;  %s578_s0 = sand.u32 7, %s2469_s20  ;;  %s1806_s5 = sshll.u32 %s575_s10, 4 }
  0x67   :  { %1862 = vmatprep.subr.bf16.mxu0 %v1861_v27  ;;  %v144_v10 = vld [vmem:[#allocation8 + $0x128] sm:$0xff]  ;;  %v146_v11 = vld [vmem:[#allocation8 + $0x138] sm:$0xff]  ;;  %v2423_v14 = vpack.c.bf16 %v336_v6, %v334_v5  ;;  %v333_v15 = vld [vmem:[#allocation10 + $0x60] sm:$0xff]  ;;  %v1879_v17 = vpack.c.bf16 %v141_v9, %v139_v8  ;;  %s2504_s12 = sadd.s32 %s1803_s9, %s396_s30  ;;  %s2506_s15 = sadd.s32 %s1804_s4, %s406_s11 }
  0x68   :  { %v335_v16 = vld [vmem:[#allocation10 + $0x70] sm:$0xff]  ;;  %v1881_v18 = vpack.c.bf16 %v146_v11, %v144_v10  ;;  %v143_v19 = vld [vmem:[#allocation8 + $0x120] sm:$0xff]  ;;  %v148_v21 = vld [vmem:[#allocation8 + $0x148] sm:$0xff]  ;;  %v2471_v61 = vsub.s32 0, %v162_v60  ;;  %v2476_v63 = vsub.s32 1, %v162_v60  ;;  %s2508_s16 = sadd.s32 %s1805_s14, %s568_s13  ;;  %s585_s17 = sshra.s32 %s2488_s2, 3 }
  0x69   :  { %1906 = vmatpush1.bf16.msra.mxu1 %v2414_v0  ;;  %v145_v20 = vld [vmem:[#allocation8 + $0x130] sm:$0xff]  ;;  %v150_v22 = vld [vmem:[#allocation8 + $0x158] sm:$0xff]  ;;  %v2426_v23 = vpack.c.bf16 %v335_v16, %v333_v15  ;;  %v147_v26 = vld [vmem:[#allocation8 + $0x140] sm:$0xff]  ;;  %s2511_s18 = sadd.s32 %s1806_s5, %s578_s0  ;;  %s588_s19 = sand.u32 7, %s2488_s2 }
  0x6a   :  { %1864 = vmatpush1.bf16.msra.mxu0 %v1863_v32  ;;  %1908 = vmatprep.subr.bf16.mxu1 %v2417_v1  ;;  %v1883_v24 = vpack.c.bf16 %v145_v20, %v143_v19  ;;  %v1885_v25 = vpack.c.bf16 %v150_v22, %v148_v21  ;;  %v149_v27 = vld [vmem:[#allocation8 + $0x150] sm:$0xff]  ;;  %v152_v28 = vld [vmem:[#allocation8 + $0x168] sm:$0xff]  ;;  %v154_v29 = vld [vmem:[#allocation8 + $0x178] sm:$0xff]  ;;  %s2516_s21 = sld [smem:[#allocation3 + $0x2]]  ;;  %s1807_s22 = sshll.u32 %s585_s17, 4 }
  0x6b   :  { %1866 = vmatprep.subr.bf16.mxu0 %v1865_v33  ;;  %v1887_v30 = vpack.c.bf16 %v149_v27, %v147_v26  ;;  %v1889_v31 = vpack.c.bf16 %v154_v29, %v152_v28  ;;  %v151_v32 = vld [vmem:[#allocation8 + $0x160] sm:$0xff]  ;;  %v153_v33 = vld [vmem:[#allocation8 + $0x170] sm:$0xff]  ;;  %v156_v34 = vld [vmem:[#allocation8 + $0x188] sm:$0xff]  ;;  %s2522_s26 = sld [smem:[#allocation3 + $0x5]]  ;;  %s2528_s25 = sadd.s32 %s1807_s22, %s588_s19 }
  0x6c   :  { %v158_v35 = vld [vmem:[#allocation8 + $0x198] sm:$0x1]  ;;  %v1891_v36 = vpack.c.bf16 %v153_v33, %v151_v32  ;;  %v155_v38 = vld [vmem:[#allocation8 + $0x180] sm:$0xff]  ;;  %vm1894_vm3 = vmpackc.low %vm193_vm1, %vm2290_vm2  ;;  %s2524_s2 = sld [smem:[#allocation3 + $0x85]]  ;;  %s2532_s29 = sld [smem:[#allocation3 + $0x3]]  ;;  %v338_v32 = vand.u32 127, %v161_v56 }
  0x6d   :  { %1910 = vmatpush1.bf16.msra.mxu1 %v2420_v13  ;;  %v1893_v37 = vpack.c.bf16 %v158_v35, %v156_v34  ;;  %v93_v41 = vld [vmem:[#allocation7] sm:$0xff]  ;;  %v95_v43 = vld [vmem:[#allocation7 + $0x10] sm:$0xff]  ;;  %v98_v44 = vld [vmem:[#allocation7 + $0x28] sm:$0xff]  ;;  %s2534_s30 = sld [smem:[#allocation3 + $0x83]]  ;;  %s2538_s9 = sld [smem:[#allocation3 + $0x4]] }
  0x6e   :  { %1868 = vmatpush1.bf16.msra.mxu0 %v1867_v39  ;;  %1912 = vmatprep.subr.bf16.mxu1 %v2423_v14  ;;  %v157_v39 = vld [vmem:[#allocation8 + $0x190] sm:$0x1]  ;;  %v100_v46 = vld [vmem:[#allocation7 + $0x38] sm:$0xff]  ;;  %v99_v47 = vld [vmem:[#allocation7 + $0x30] sm:$0xff]  ;;  %s768_s10 = sshra.s32 %s2519_s23, 3  ;;  %s2542_s11 = sld [smem:[#allocation3 + $0x84]] }
  0x6f   :  { %1870 = vmatprep.subr.bf16.mxu0 %v1869_v42  ;;  %v1896_v40 = vpack.c.bf16 %v157_v39, %v155_v38  ;;  %v96_v42 = vld [vmem:[#allocation7 + $0x18] sm:$0xff]  ;;  %v97_v45 = vld [vmem:[#allocation7 + $0x20] sm:$0xff]  ;;  %v102_v48 = vld [vmem:[#allocation7 + $0x48] sm:$0xff]  ;;  %s771_s5 = sand.u32 7, %s2519_s23  ;;  %s1810_s17 = sshll.u32 %s768_s10, 4  ;;  %v344_v38 = vand.u32 63, %v338_v32 }
  0x70   :  { %v101_v49 = vld [vmem:[#allocation7 + $0x40] sm:$0xff]  ;;  %v104_v52 = vld [vmem:[#allocation7 + $0x58] sm:$0xff]  ;;  %v106_v54 = vld [vmem:[#allocation7 + $0x68] sm:$0x3]  ;;  %s758_s8 = sshra.s32 %s2516_s21, 3  ;;  %s761_s4 = sand.u32 7, %s2516_s21 }
  0x71   :  { %1914 = vmatpush1.bf16.msra.mxu1 %v2426_v23  ;;  %v105_v55 = vld [vmem:[#allocation7 + $0x60] sm:$0x3]  ;;  %v159_v62 = vld [vmem:[%s2916_s3] sm:$0x3]  ;;  %s2490_s3 = sld [smem:[#allocation3 + $0x86]]  ;;  %s778_s13 = sshra.s32 %s2522_s26, 3 }
  0x72   :  { %1872 = vmatpush1.bf16.msra.mxu0 %v1871_v53  ;;  %1916 = vmatprep.subr.bf16.mxu1 %v2406_v50  ;;  %v103_v53 = vld [vmem:[#allocation7 + $0x50] sm:$0xff]  ;;  %v2481_v2 = vrot.slane %v159_v62, %v2471_v61  ;;  %v2486_v3 = vrot.slane %v159_v62, %v2476_v63  ;;  %s1809_s14 = sshll.u32 %s758_s8, 4  ;;  %s788_s0 = sshra.s32 %s2524_s2, 3  ;;  %vm2577_vm4 = vcmp.lt.s32.totalorder %v344_v38, 32 }
  0x73   :  { %1874 = vmatprep.subr.bf16.mxu0 %v1873_v57  ;;  %s781_s19 = sand.u32 7, %s2522_s26  ;;  %s791_s21 = sand.u32 7, %s2524_s2 }
  0x74   :  { %531 = vmatmul.mubr.f32.vlgmr.msra.gmra.mrb[0].mxu1 %v2289_v12  ;;  %s1812_s22 = sshll.u32 %s788_s0, 4  ;;  %s951_s2 = sshra.s32 %s2532_s29, 3 }
  0x75   :  { %1918 = vmatpush1.bf16.msra.mxu1 %v2408_v51  ;;  %723 = vmatprep.mubr.f32.mxu1 %v2289_v12  ;;  %s2563_s26 = sadd.s32 %s1812_s22, %s791_s21  ;;  %s961_s8 = sshra.s32 %s2534_s30, 3 }
  0x76   :  { %1876 = vmatpush1.bf16.msra.mxu0 %v1875_v4  ;;  %1920 = vmatprep.subr.bf16.mxu1 %v2411_v59  ;;  %s954_s10 = sand.u32 7, %s2532_s29  ;;  %s964_s0 = sand.u32 7, %s2534_s30 }
  0x77   :  { %1878 = vmatprep.subr.bf16.mxu0 %v1877_v7  ;;  %s595_s20 = sshra.s32 %s2490_s3, 3  ;;  %s598_s24 = sand.u32 7, %s2490_s3 }
  0x78   :  { %s1808_s1 = sshll.u32 %s595_s20, 4  ;;  %s1811_s20 = sshll.u32 %s778_s13, 4 }
  0x79   :  { %1922 = vmatpush1.bf16.msra.mxu1 %v2414_v0  ;;  %s2530_s3 = sadd.s32 %s1808_s1, %s598_s24  ;;  %s2553_s24 = sadd.s32 %s1809_s14, %s761_s4 }
  0x7a   :  { %1880 = vmatpush1.bf16.msra.mxu0 %v1879_v17  ;;  %1924 = vmatprep.subr.bf16.mxu1 %v2417_v1  ;;  %s2555_s1 = sadd.s32 %s1810_s17, %s771_s5  ;;  %s2558_s23 = sadd.s32 %s1811_s20, %s781_s19 }
  0x7b   :  { %1882 = vmatprep.subr.bf16.mxu0 %v1881_v18  ;;  %s971_s4 = sshra.s32 %s2538_s9, 3  ;;  %s2570_s13 = sshll.u32 %s951_s2, 4 }
  0x7c   :  { %s981_s14 = sshra.s32 %s2542_s11, 3  ;;  %s1814_s5 = sshll.u32 %s961_s8, 4 }
  0x7d   :  { %1926 = vmatpush1.bf16.msra.mxu1 %v2420_v13  ;;  %s974_s17 = sand.u32 7, %s2538_s9  ;;  %s2575_s19 = sshll.u32 %s971_s4, 4 }
  0x7e   :  { %1884 = vmatpush1.bf16.msra.mxu0 %v1883_v24  ;;  %1928 = vmatprep.subr.bf16.mxu1 %v2423_v14  ;;  %s984_s20 = sand.u32 7, %s2542_s11  ;;  %s2586_s21 = sshll.u32 %s981_s14, 4 }
  0x7f   :  { %1886 = vmatprep.subr.bf16.mxu0 %v1885_v25  ;;  %s380_s22 = scalar_lea.vmem [#allocation2], %s2478_s27  ;;  %s390_s2 = scalar_lea.vmem [#allocation2], %s2483_s28 }
  0x80   :  { %s400_s8 = scalar_lea.vmem [#allocation2], %s2504_s12  ;;  %s410_s4 = scalar_lea.vmem [#allocation2], %s2506_s15 }
  0x81   :  { %1930 = vmatpush1.bf16.msra.mxu1 %v2426_v23  ;;  %s572_s27 = scalar_lea.vmem [#allocation2], %s2508_s16  ;;  %s582_s28 = scalar_lea.vmem [#allocation2], %s2511_s18 }
  0x82   :  { %1888 = vmatpush1.bf16.msra.mxu0 %v1887_v30  ;;  %1932 = vmatprep.subr.bf16.mxu1 %v2406_v50  ;;  %s2605_s12 = sadd.s32 %s2570_s13, %s954_s10  ;;  %s2609_s15 = sadd.s32 %s1814_s5, %s964_s0 }
  0x83   :  { %1890 = vmatprep.subr.bf16.mxu0 %v1889_v31  ;;  %s592_s16 = scalar_lea.vmem [#allocation2], %s2528_s25  ;;  %s602_s18 = scalar_lea.vmem [#allocation2], %s2530_s3 }
  0x84   :  { %s765_s25 = scalar_lea.vmem [#allocation2], %s2553_s24  ;;  %s2636_s3 = sadd.s32 %s2575_s19, %s974_s17 }
  0x85   :  { %s2641_s29 = sadd.s32 %s2586_s21, %s984_s20  ;;  %s775_s30 = scalar_lea.vmem [#allocation2], %s2555_s1 }
  0x86   :  { %1892 = vmatpush1.bf16.msra.mxu0 %v1891_v36  ;;  %s785_s9 = scalar_lea.vmem [#allocation2], %s2558_s23  ;;  %s795_s11 = scalar_lea.vmem [#allocation2], %s2563_s26 }
  0x87   :  { %1895 = vmatprep.subr.msk.bf16.mxu0 %vm1894_vm3, %v1893_v37  ;;  %v2561_v37 = vadd.s32 128, %v338_v32  ;;  %s958_s24 = scalar_lea.vmem [#allocation2], %s2605_s12  ;;  %s968_s1 = scalar_lea.vmem [#allocation2], %s2609_s15 }
  0x88   :  { %s978_s23 = scalar_lea.vmem [#allocation2], %s2636_s3  ;;  %s988_s26 = scalar_lea.vmem [#allocation2], %s2641_s29 }
  0x89   :  { %v351_v39 = vand.u32 63, %v2561_v37  ;;  %vm369_vm6 = vcmp.lt.s32.totalorder %v2561_v37, 192  ;;  %s2291_s10 = smov 64   ;;  %s2294_s0 = smov [#allocation13]  }
  0x8a   :  { %1898 = vmatpush1.bf16.msk.msra.mxu0 %vm1894_vm3, %v1896_v40  ;;  %s1660_s5 = sshll.u32 %s2294_s0, 4  ;;  %s1661_s5 = int_to_ptr.vmem [resolvable:$true] %s1660_s5 }
  0x8b   :  { %1964 = vmatprep.subr.bf16.mxu0 %v2406_v50  ;;  %vm2581_vm5 = vcmp.lt.s32.totalorder %v351_v39, 32  ;;  %s2248_s17 = scalar_lea.vmem %s1661_s5, 32  ;;  %p2253_p8 = scmp.lt.s32.totalorder %s1661_s5, %s1661_s5 }
  0x8c   :  { %p2249_p7 = scmp.ne.s32.totalorder %s1661_s5, %s2248_s17  ;;  %p2254_p9 = scmp.lt.s32.totalorder %s2248_s17, %s2248_s17 }
  0x8d   :  { %265 = vmatmul.mubr.f32.vlgmr.msra.gmra.mrb[0].mxu0 %v93_v41 }
  0x8e   :  { %1723 = vmatprep.mubr.msk.f32.mxu0 %vm171_vm0, %v96_v42  ;;  %1966 = vmatpush1.bf16.msra.mxu0 %v2408_v51  ;;  %p2255_p10 = por %p2254_p9, %p2253_p8 }
  0x8f   :  { %1968 = vmatprep.subr.bf16.mxu0 %v2411_v59 }
  0x90   :  { %p2256_p11 = pnand %p2255_p10, %p2249_p7 }
  0x91   :  { %271 = vmatmul.mubr.f32.gmra.mrb[2].mxu0 %v95_v43 }
  0x92   :  { %1724 = vmatprep.mubr.msk.f32.mxu0 %vm171_vm0, %v98_v44  ;;  %1970 = vmatpush1.bf16.msra.mxu0 %v2414_v0 }
  0x93   :  { %1972 = vmatprep.subr.bf16.mxu0 %v2417_v1 }
  0x95   :  { %277 = vmatmul.mubr.f32.gmra.mrb[4].mxu0 %v97_v45 }
  0x96   :  { %1725 = vmatprep.mubr.msk.f32.mxu0 %vm171_vm0, %v100_v46  ;;  %1974 = vmatpush1.bf16.msra.mxu0 %v2420_v13 }
  0x97   :  { %1976 = vmatprep.subr.bf16.mxu0 %v2423_v14 }
  0x99   :  { %283 = vmatmul.mubr.f32.gmra.mrb[6].mxu0 %v99_v47 }
  0x9a   :  { %1726 = vmatprep.mubr.msk.f32.mxu0 %vm171_vm0, %v102_v48  ;;  %1978 = vmatpush1.bf16.msra.mxu0 %v2426_v23 }
  0x9b   :  { %1996 = vmatprep.subr.bf16.mxu0 %v2406_v50 }
  0x9d   :  { %289 = vmatmul.mubr.f32.gmra.mrb[8].mxu0 %v101_v49 }
  0x9e   :  { %1727 = vmatprep.mubr.msk.f32.mxu0 %vm171_vm0, %v104_v52 }
  0xa1   :  { %295 = vmatmul.mubr.f32.gmra.mrb[10].mxu0 %v103_v53 }
  0xa2   :  { %1728 = vmatprep.mubr.msk.f32.mxu0 %vm171_vm0, %v106_v54 }
  0xa5   :  { %301 = vmatmul.mubr.f32.gmra.mrb[12].mxu0 %v105_v55 }
  0xa6   :  { %1214 = vmatprep.mubr.f32.mxu0 %v2289_v12 }
 0x147   :  { %v2458_v57 = vpop.f32.mrb[0].mxu1 }
 0x148   :  { %v2460_v58 = vpop.f32.mrb[1].mxu1 }
 0x160   :  { %v266_v4 = vpop.f32.mrb[0].mxu0 }
 0x161   :  { %v267_v5 = vadd.f32 %v266_v4, %v2481_v2  ;;  %v268_v6 = vpop.f32.mrb[1].mxu0 }
 0x162   :  { %v269_v7 = vadd.f32 %v268_v6, %v2486_v3 }
 0x163   :  { %307 = vst [vmem:[#allocation2] sm:$0xff] %v267_v5 }
 0x164   :  { %308 = vst [vmem:[#allocation2 + $0x8] sm:$0xff] %v269_v7  ;;  %v272_v8 = vpop.f32.mrb[2].mxu0 }
 0x165   :  { %v273_v9 = vadd.f32 %v272_v8, %v2481_v2  ;;  %v274_v10 = vpop.f32.mrb[3].mxu0 }
 0x166   :  { %v275_v11 = vadd.f32 %v274_v10, %v2486_v3 }
 0x167   :  { %309 = vst [vmem:[#allocation2 + $0x10] sm:$0xff] %v273_v9 }
 0x168   :  { %310 = vst [vmem:[#allocation2 + $0x18] sm:$0xff] %v275_v11  ;;  %v278_v15 = vpop.f32.mrb[4].mxu0 }
 0x169   :  { %v279_v16 = vadd.f32 %v278_v15, %v2481_v2  ;;  %v280_v17 = vpop.f32.mrb[5].mxu0 }
 0x16a   :  { %v281_v18 = vadd.f32 %v280_v17, %v2486_v3 }
 0x16b   :  { %311 = vst [vmem:[#allocation2 + $0x20] sm:$0xff] %v279_v16 }
 0x16c   :  { %312 = vst [vmem:[#allocation2 + $0x28] sm:$0xff] %v281_v18  ;;  %v284_v19 = vpop.f32.mrb[6].mxu0 }
 0x16d   :  { %v285_v20 = vadd.f32 %v284_v19, %v2481_v2  ;;  %v286_v21 = vpop.f32.mrb[7].mxu0 }
 0x16e   :  { %v287_v22 = vadd.f32 %v286_v21, %v2486_v3 }
 0x16f   :  { %313 = vst [vmem:[#allocation2 + $0x30] sm:$0xff] %v285_v20 }
 0x170   :  { %314 = vst [vmem:[#allocation2 + $0x38] sm:$0xff] %v287_v22  ;;  %v290_v24 = vpop.f32.mrb[8].mxu0 }
 0x171   :  { %v291_v25 = vadd.f32 %v290_v24, %v2481_v2  ;;  %v292_v26 = vpop.f32.mrb[9].mxu0 }
 0x172   :  { %v293_v27 = vadd.f32 %v292_v26, %v2486_v3 }
 0x173   :  { %315 = vst [vmem:[#allocation2 + $0x40] sm:$0xff] %v291_v25 }
 0x174   :  { %316 = vst [vmem:[#allocation2 + $0x48] sm:$0xff] %v293_v27  ;;  %v296_v28 = vpop.f32.mrb[10].mxu0 }
 0x175   :  { %v297_v29 = vadd.f32 %v296_v28, %v2481_v2  ;;  %v298_v30 = vpop.f32.mrb[11].mxu0 }
 0x176   :  { %v299_v31 = vadd.f32 %v298_v30, %v2486_v3 }
 0x177   :  { %317 = vst [vmem:[#allocation2 + $0x50] sm:$0xff] %v297_v29 }
 0x178   :  { %318 = vst [vmem:[#allocation2 + $0x58] sm:$0xff] %v299_v31  ;;  %v302_v33 = vpop.f32.mrb[12].mxu0 }
 0x179   :  { %v303_v34 = vadd.f32 %v302_v33, %v2481_v2  ;;  %v304_v35 = vpop.f32.mrb[13].mxu0 }
 0x17a   :  { %v305_v36 = vadd.f32 %v304_v35, %v2486_v3 }
 0x17b   :  { %319 = vst [vmem:[#allocation2 + $0x60] sm:$0x3] %v303_v34 }
 0x17c   :  { %320 = vst [vmem:[#allocation2 + $0x68] sm:$0x3] %v305_v36 }
 0x183   :  { %v381_v42 = vld [vmem:[%s380_s22] ss:$8 sm:$0x3] }
 0x184   :  { %v391_v43 = vld [vmem:[%s390_s2] ss:$8 sm:$0x3]  ;;  %v416_v46 = vrot.slane %v381_v42, %v2471_v61  ;;  %v420_v48 = vrot.slane %v381_v42, %v2476_v63 }
 0x185   :  { %v401_v44 = vld [vmem:[%s400_s8] ss:$8 sm:$0x3]  ;;  %v427_v47 = vrot.slane %v391_v43, %v2471_v61  ;;  %v431_v49 = vrot.slane %v391_v43, %v2476_v63 }
 0x186   :  { %v411_v45 = vld [vmem:[%s410_s4] ss:$8 sm:$0x3]  ;;  %v440_v52 = vrot.slane %v401_v44, %v2471_v61  ;;  %v444_v54 = vrot.slane %v401_v44, %v2476_v63 }
 0x187   :  { %v451_v53 = vrot.slane %v411_v45, %v2471_v61  ;;  %v455_v55 = vrot.slane %v411_v45, %v2476_v63  ;;  %v573_v56 = vld [vmem:[%s572_s27] ss:$8 sm:$0x3]  ;;  %v2612_v62 = vsel %vm193_vm1, %v416_v46, %v427_v47  ;;  %v2615_v2 = vsel %vm193_vm1, %v420_v48, %v431_v49 }
 0x188   :  { %v583_v60 = vld [vmem:[%s582_s28] ss:$8 sm:$0x3]  ;;  %v608_v5 = vrot.slane %v573_v56, %v2471_v61  ;;  %v612_v22 = vrot.slane %v573_v56, %v2476_v63 }
 0x189   :  { %v2618_v3 = vld [vmem:[%s592_s16] ss:$8 sm:$0x3]  ;;  %v619_v6 = vrot.slane %v583_v60, %v2471_v61  ;;  %v2624_v7 = vsel %vm193_vm1, %v440_v52, %v451_v53  ;;  %v2627_v8 = vsel %vm193_vm1, %v444_v54, %v455_v55  ;;  %v623_v24 = vrot.slane %v583_v60, %v2476_v63 }
 0x18a   :  { %v603_v4 = vld [vmem:[%s602_s18] ss:$8 sm:$0x3]  ;;  %v632_v9 = vrot.slane %v2618_v3, %v2471_v61  ;;  %v460_v15 = vsel %vm2577_vm4, %v2612_v62, %v2624_v7  ;;  %v461_v16 = vsel %vm2581_vm5, %v2615_v2, %v2627_v8 }
 0x18b   :  { %v643_v10 = vrot.slane %v603_v4, %v2471_v61  ;;  %v766_v11 = vld [vmem:[%s765_s25] ss:$8 sm:$0x3]  ;;  %v537_v18 = vadd.f32 %v2458_v57, %v460_v15  ;;  %v538_v19 = vadd.f32 %v2460_v58, %v461_v16  ;;  %v2660_v28 = vsel %vm193_vm1, %v608_v5, %v619_v6 }
 0x18c   :  { %v776_v17 = vld [vmem:[%s775_s30] ss:$8 sm:$0x3]  ;;  %v801_v25 = vrot.slane %v766_v11, %v2471_v61  ;;  %v636_v58 = vrot.slane %v2618_v3, %v2476_v63  ;;  %v647_v34 = vrot.slane %v603_v4, %v2476_v63  ;;  %v805_v35 = vrot.slane %v766_v11, %v2476_v63 }
 0x18d   :  { %v786_v20 = vld [vmem:[%s785_s9] ss:$8 sm:$0x3]  ;;  %v1740_v26 = vmul.f32 -1.442695, %v537_v18  ;;  %v2663_v57 = vsel %vm193_vm1, %v632_v9, %v643_v10  ;;  %v812_v29 = vrot.slane %v776_v17, %v2471_v61  ;;  %v816_v36 = vrot.slane %v776_v17, %v2476_v63 }
 0x18e   :  { %v796_v21 = vld [vmem:[%s795_s11] ss:$8 sm:$0x3]  ;;  %v1741_v27 = vmul.f32 -1.442695, %v538_v19  ;;  %v825_v30 = vrot.slane %v786_v20, %v2471_v61  ;;  %v2678_v42 = vsel %vm193_vm1, %v612_v22, %v623_v24  ;;  %v829_v44 = vrot.slane %v786_v20, %v2476_v63 }
 0x18f   :  { %v836_v31 = vrot.slane %v796_v21, %v2471_v61  ;;  %v959_v32 = vld [vmem:[%s958_s24] ss:$8 sm:$0x3]  ;;  %2054 = vpow2.f32 %v1740_v26  ;;  %v2681_v43 = vsel %vm193_vm1, %v801_v25, %v812_v29  ;;  %v2688_v46 = vsel %vm193_vm1, %v805_v35, %v816_v36 }
 0x190   :  { %v969_v33 = vld [vmem:[%s968_s1] ss:$8 sm:$0x3]  ;;  %2056 = vpow2.f32 %v1741_v27  ;;  %v840_v47 = vrot.slane %v796_v21, %v2476_v63  ;;  %v994_v48 = vrot.slane %v959_v32, %v2471_v61  ;;  %v998_v54 = vrot.slane %v959_v32, %v2476_v63 }
 0x191   :  { %v979_v38 = vld [vmem:[%s978_s23] ss:$8 sm:$0x3]  ;;  %v2685_v45 = vsel %vm193_vm1, %v825_v30, %v836_v31  ;;  %v1005_v49 = vrot.slane %v969_v33, %v2471_v61  ;;  %v1009_v56 = vrot.slane %v969_v33, %v2476_v63  ;;  %v2703_v4 = vsel %vm193_vm1, %v636_v58, %v647_v34 }
 0x192   :  { %v989_v39 = vld [vmem:[%s988_s26] ss:$8 sm:$0x3]  ;;  %v1018_v52 = vrot.slane %v979_v38, %v2471_v61  ;;  %v2697_v55 = vsel %vm193_vm1, %v829_v44, %v840_v47  ;;  %v1022_v60 = vrot.slane %v979_v38, %v2476_v63  ;;  %v1353_v16 = vsel %vm2577_vm4, %v2663_v57, %v2660_v28 }
 0x193   :  { %v1029_v53 = vrot.slane %v989_v39, %v2471_v61  ;;  %v1033_v3 = vrot.slane %v989_v39, %v2476_v63  ;;  %v2706_v5 = vsel %vm193_vm1, %v994_v48, %v1005_v49  ;;  %v1248_v61 = vsel %vm2577_vm4, %v2685_v45, %v2681_v43 }
 0x194   :  { %v2716_v9 = vsel %vm193_vm1, %v998_v54, %v1009_v56  ;;  %v1249_v15 = vsel %vm2581_vm5, %v2697_v55, %v2688_v46  ;;  %v1354_v17 = vsel %vm2581_vm5, %v2703_v4, %v2678_v42  ;;  %v1458_v18 = vsel %vm2577_vm4, %v2624_v7, %v2612_v62 }
 0x195   :  { %v2709_v6 = vsel %vm193_vm1, %v1018_v52, %v1029_v53  ;;  %v2719_v10 = vsel %vm193_vm1, %v1022_v60, %v1033_v3  ;;  %v1459_v20 = vsel %vm2581_vm5, %v2627_v8, %v2615_v2  ;;  %2058 = vtanh.f32 %v538_v19  ;;  %v1563_v2 = vld [vmem:[#allocation11] sm:$0xff]  ;;  %v1564_v8 = vld [vmem:[#allocation11 + $0x8] sm:$0xff] }
 0x196   :  { %v1143_v63 = vsel %vm2577_vm4, %v2709_v6, %v2706_v5  ;;  %v1144_v11 = vsel %vm2581_vm5, %v2719_v10, %v2716_v9  ;;  %v652_v36 = vsel %vm2577_vm4, %v2660_v28, %v2663_v57  ;;  %v653_v44 = vsel %vm2581_vm5, %v2678_v42, %v2703_v4 }
 0x199   :  { %v2055_v21 = vpop.eup %2054 }
 0x19a   :  { %v2057_v22 = vpop.eup %2056  ;;  %v547_v24 = vadd.f32 1.0, %v2055_v21 }
 0x19b   :  { %v548_v25 = vadd.f32 1.0, %v2057_v22 }
 0x19c   :  { %2060 = vrcp.f32 %v547_v24 }
 0x19d   :  { %2062 = vrcp.f32 %v548_v25 }
 0x19f   :  { %v2059_v26 = vpop.eup %2058 }
 0x1a6   :  { %v2061_v27 = vpop.eup %2060 }
 0x1a7   :  { %v2063_v58 = vpop.eup %2062  ;;  %v555_v31 = vmul.f32 0.0, %v2061_v27 }
 0x1a8   :  { %v554_v29 = vsel %vm369_vm6, %v2059_v26, %v2063_v58 }
 0x1a9   :  { %v556_v30 = vmul.f32 %v2061_v27, %v554_v29 }
 0x1ab   :  { %558 = vrot.lane.b32.xlu0 %v556_v30, %s2291_s10 }
 0x21d   :  { %v559_v32 = vpop.permute.xlu0 %558 }
 0x21e   :  { %v561_v33 = vadd.f32 %v559_v32, %v555_v31  ;;  %v845_v32 = vsel %vm2577_vm4, %v2681_v43, %v2685_v45 }
 0x220   :  { %2064 = vtanh.f32 %v561_v33 }
 0x22a   :  { %v2065_v19 = vpop.eup %2064 }
 0x22b   :  { %v563_v34 = vmul.f32 %v2065_v19, %v554_v29 }
 0x22d   :  { %655 = vrot.lane.b32.xlu0 %v563_v34, %s2291_s10  ;;  %v846_v34 = vsel %vm2581_vm5, %v2688_v46, %v2697_v55 }
 0x29f   :  { %v656_v35 = vpop.permute.xlu0 %655 }
 0x2a0   :  { %1754 = vmatmul.mubr.msk.f32.vlgmr.msra.gmra.mrb[2].mxu1 %vm462_vm7, %v656_v35 }
 0x2a1   :  { %1934 = vmatpush1.bf16.msra.mxu1 %v2408_v51  ;;  %916 = vmatprep.mubr.f32.mxu1 %v2289_v12 }
 0x2a2   :  { %1936 = vmatprep.subr.bf16.mxu1 %v2411_v59 }
 0x2a5   :  { %1938 = vmatpush1.bf16.msra.mxu1 %v2414_v0 }
 0x2a6   :  { %1940 = vmatprep.subr.bf16.mxu1 %v2417_v1 }
 0x2a9   :  { %1942 = vmatpush1.bf16.msra.mxu1 %v2420_v13 }
 0x2aa   :  { %1944 = vmatprep.subr.bf16.mxu1 %v2423_v14 }
 0x2ad   :  { %1946 = vmatpush1.bf16.msra.mxu1 %v2426_v23 }
 0x2ae   :  { %1948 = vmatprep.subr.bf16.mxu1 %v2406_v50 }
 0x373   :  { %v725_v38 = vpop.f32.mrb[2].mxu1 }
 0x374   :  { %v730_v39 = vadd.f32 %v725_v38, %v652_v36  ;;  %v727_v47 = vpop.f32.mrb[3].mxu1 }
 0x375   :  { %v731_v48 = vadd.f32 %v727_v47, %v653_v44 }
 0x376   :  { %v1755_v49 = vmul.f32 -1.442695, %v730_v39 }
 0x377   :  { %v1756_v52 = vmul.f32 -1.442695, %v731_v48 }
 0x378   :  { %2066 = vpow2.f32 %v1755_v49 }
 0x379   :  { %2068 = vpow2.f32 %v1756_v52 }
 0x37a   :  { %2070 = vtanh.f32 %v731_v48 }
 0x382   :  { %v2067_v53 = vpop.eup %2066 }
 0x383   :  { %v2069_v54 = vpop.eup %2068  ;;  %v740_v56 = vadd.f32 1.0, %v2067_v53 }
 0x384   :  { %v741_v60 = vadd.f32 1.0, %v2069_v54  ;;  %v2071_v3 = vpop.eup %2070 }
 0x386   :  { %2072 = vrcp.f32 %v741_v60 }
 0x387   :  { %2074 = vrcp.f32 %v740_v56 }
 0x390   :  { %v2073_v21 = vpop.eup %2072 }
 0x391   :  { %v2075_v22 = vpop.eup %2074  ;;  %v747_v24 = vsel %vm369_vm6, %v2071_v3, %v2073_v21 }
 0x392   :  { %v749_v25 = vmul.f32 %v2075_v22, %v747_v24  ;;  %v748_v26 = vmul.f32 %v2075_v22, %v561_v33 }
 0x394   :  { %751 = vrot.lane.b32.xlu1 %v749_v25, %s2291_s10 }
 0x406   :  { %v752_v27 = vpop.permute.xlu1 %751 }
 0x407   :  { %v754_v58 = vadd.f32 %v752_v27, %v748_v26  ;;  %v1038_v27 = vsel %vm2577_vm4, %v2706_v5, %v2709_v6 }
 0x409   :  { %2076 = vtanh.f32 %v754_v58 }
 0x413   :  { %v2077_v29 = vpop.eup %2076 }
 0x414   :  { %v756_v30 = vmul.f32 %v2077_v29, %v747_v24 }
 0x416   :  { %848 = vrot.lane.b32.xlu1 %v756_v30, %s2291_s10  ;;  %v1039_v30 = vsel %vm2581_vm5, %v2716_v9, %v2719_v10 }
 0x488   :  { %v849_v31 = vpop.permute.xlu1 %848 }
 0x489   :  { %1769 = vmatmul.mubr.msk.f32.vlgmr.msra.gmra.mrb[4].mxu1 %vm462_vm7, %v849_v31 }
 0x48a   :  { %1950 = vmatpush1.bf16.msra.mxu1 %v2408_v51  ;;  %1109 = vmatprep.mubr.f32.mxu1 %v2289_v12 }
 0x48b   :  { %1952 = vmatprep.subr.bf16.mxu1 %v2411_v59 }
 0x48e   :  { %1954 = vmatpush1.bf16.msra.mxu1 %v2414_v0 }
 0x48f   :  { %1956 = vmatprep.subr.bf16.mxu1 %v2417_v1 }
 0x492   :  { %1958 = vmatpush1.bf16.msra.mxu1 %v2420_v13 }
 0x493   :  { %1960 = vmatprep.subr.bf16.mxu1 %v2423_v14 }
 0x496   :  { %1962 = vmatpush1.bf16.msra.mxu1 %v2426_v23 }
 0x497   :  { %1980 = vmatprep.subr.bf16.mxu1 %v2406_v50 }
 0x55c   :  { %v918_v33 = vpop.f32.mrb[4].mxu1 }
 0x55d   :  { %v923_v19 = vadd.f32 %v918_v33, %v845_v32  ;;  %v920_v35 = vpop.f32.mrb[5].mxu1 }
 0x55e   :  { %v924_v36 = vadd.f32 %v920_v35, %v846_v34 }
 0x55f   :  { %v1770_v38 = vmul.f32 -1.442695, %v923_v19 }
 0x560   :  { %v1771_v39 = vmul.f32 -1.442695, %v924_v36 }
 0x561   :  { %2078 = vpow2.f32 %v1770_v38 }
 0x562   :  { %2080 = vpow2.f32 %v1771_v39 }
 0x563   :  { %2082 = vtanh.f32 %v924_v36 }
 0x56b   :  { %v2079_v44 = vpop.eup %2078 }
 0x56c   :  { %v2081_v47 = vpop.eup %2080  ;;  %v933_v48 = vadd.f32 1.0, %v2079_v44 }
 0x56d   :  { %v934_v49 = vadd.f32 1.0, %v2081_v47  ;;  %v2083_v52 = vpop.eup %2082 }
 0x56f   :  { %2084 = vrcp.f32 %v934_v49 }
 0x570   :  { %2086 = vrcp.f32 %v933_v48 }
 0x579   :  { %v2085_v53 = vpop.eup %2084 }
 0x57a   :  { %v2087_v54 = vpop.eup %2086  ;;  %v940_v56 = vsel %vm369_vm6, %v2083_v52, %v2085_v53 }
 0x57b   :  { %v942_v60 = vmul.f32 %v2087_v54, %v940_v56  ;;  %v941_v3 = vmul.f32 %v2087_v54, %v754_v58 }
 0x57d   :  { %944 = vrot.lane.b32.xlu0 %v942_v60, %s2291_s10 }
 0x5ef   :  { %v945_v21 = vpop.permute.xlu0 %944 }
 0x5f0   :  { %v947_v22 = vadd.f32 %v945_v21, %v941_v3 }
 0x5f2   :  { %2088 = vtanh.f32 %v947_v22 }
 0x5fc   :  { %v2089_v24 = vpop.eup %2088 }
 0x5fd   :  { %v949_v25 = vmul.f32 %v2089_v24, %v940_v56 }
 0x5ff   :  { %1041 = vrot.lane.b32.xlu1 %v949_v25, %s2291_s10 }
 0x671   :  { %v1042_v26 = vpop.permute.xlu1 %1041 }
 0x672   :  { %1784 = vmatmul.mubr.msk.f32.vlgmr.msra.gmra.mrb[6].mxu1 %vm462_vm7, %v1042_v26 }
 0x673   :  { %1982 = vmatpush1.bf16.msra.mxu1 %v2408_v51  ;;  %1319 = vmatprep.mubr.f32.mxu1 %v2289_v12 }
 0x674   :  { %1984 = vmatprep.subr.bf16.mxu1 %v2411_v59 }
 0x677   :  { %1986 = vmatpush1.bf16.msra.mxu1 %v2414_v0 }
 0x678   :  { %1988 = vmatprep.subr.bf16.mxu1 %v2417_v1 }
 0x67b   :  { %1990 = vmatpush1.bf16.msra.mxu1 %v2420_v13 }
 0x67c   :  { %1992 = vmatprep.subr.bf16.mxu1 %v2423_v14 }
 0x67f   :  { %1994 = vmatpush1.bf16.msra.mxu1 %v2426_v23 }
 0x680   :  { %2012 = vmatprep.subr.bf16.mxu1 %v2406_v50 }
 0x745   :  { %v1111_v58 = vpop.f32.mrb[6].mxu1 }
 0x746   :  { %v1116_v29 = vadd.f32 %v1111_v58, %v1038_v27  ;;  %v1113_v31 = vpop.f32.mrb[7].mxu1 }
 0x747   :  { %v1117_v32 = vadd.f32 %v1113_v31, %v1039_v30 }
 0x748   :  { %v1785_v33 = vmul.f32 -1.442695, %v1116_v29 }
 0x749   :  { %v1786_v19 = vmul.f32 -1.442695, %v1117_v32 }
 0x74a   :  { %2090 = vpow2.f32 %v1785_v33 }
 0x74b   :  { %2092 = vpow2.f32 %v1786_v19 }
 0x74c   :  { %2094 = vtanh.f32 %v1117_v32 }
 0x754   :  { %v2091_v34 = vpop.eup %2090 }
 0x755   :  { %v2093_v50 = vpop.eup %2092  ;;  %v1126_v35 = vadd.f32 1.0, %v2091_v34 }
 0x756   :  { %v1127_v36 = vadd.f32 1.0, %v2093_v50  ;;  %v2095_v38 = vpop.eup %2094 }
 0x758   :  { %2096 = vrcp.f32 %v1127_v36 }
 0x759   :  { %2098 = vrcp.f32 %v1126_v35 }
 0x762   :  { %v2097_v39 = vpop.eup %2096 }
 0x763   :  { %v2099_v44 = vpop.eup %2098  ;;  %v1133_v47 = vsel %vm369_vm6, %v2095_v38, %v2097_v39 }
 0x764   :  { %v1135_v48 = vmul.f32 %v2099_v44, %v1133_v47  ;;  %v1134_v49 = vmul.f32 %v2099_v44, %v947_v22 }
 0x766   :  { %1137 = vrot.lane.b32.xlu0 %v1135_v48, %s2291_s10 }
 0x7d8   :  { %v1138_v52 = vpop.permute.xlu0 %1137 }
 0x7d9   :  { %v1140_v53 = vadd.f32 %v1138_v52, %v1134_v49 }
 0x7db   :  { %2100 = vtanh.f32 %v1140_v53 }
 0x7e5   :  { %v2101_v54 = vpop.eup %2100 }
 0x7e6   :  { %v1142_v56 = vmul.f32 %v2101_v54, %v1133_v47 }
 0x7e8   :  { %1146 = vrot.lane.b32.xlu1 %v1142_v56, %s2291_s10 }
 0x85a   :  { %v1147_v60 = vpop.permute.xlu1 %1146 }
 0x85b   :  { %1787 = vmatmul.mubr.msk.f32.vlgmr.msra.gmra.mrb[14].mxu0 %vm462_vm7, %v1147_v60 }
 0x85c   :  { %1998 = vmatpush1.bf16.msra.mxu0 %v2408_v51  ;;  %1424 = vmatprep.mubr.f32.mxu0 %v2289_v12 }
 0x85d   :  { %2000 = vmatprep.subr.bf16.mxu0 %v2411_v59 }
 0x860   :  { %2002 = vmatpush1.bf16.msra.mxu0 %v2414_v0 }
 0x861   :  { %2004 = vmatprep.subr.bf16.mxu0 %v2417_v1 }
 0x864   :  { %2006 = vmatpush1.bf16.msra.mxu0 %v2420_v13 }
 0x865   :  { %2008 = vmatprep.subr.bf16.mxu0 %v2423_v14 }
 0x868   :  { %2010 = vmatpush1.bf16.msra.mxu0 %v2426_v23 }
 0x92e   :  { %v1216_v3 = vpop.f32.mrb[14].mxu0 }
 0x92f   :  { %v1221_v21 = vadd.f32 %v1216_v3, %v1143_v63  ;;  %v1218_v22 = vpop.f32.mrb[15].mxu0 }
 0x930   :  { %v1222_v24 = vadd.f32 %v1218_v22, %v1144_v11 }
 0x931   :  { %v1788_v25 = vmul.f32 -1.442695, %v1221_v21 }
 0x932   :  { %v1789_v26 = vmul.f32 -1.442695, %v1222_v24 }
 0x933   :  { %2102 = vpow2.f32 %v1788_v25 }
 0x934   :  { %2104 = vpow2.f32 %v1789_v26 }
 0x935   :  { %2106 = vtanh.f32 %v1222_v24 }
 0x93d   :  { %v2103_v27 = vpop.eup %2102 }
 0x93e   :  { %v2105_v58 = vpop.eup %2104  ;;  %v1231_v29 = vadd.f32 1.0, %v2103_v27 }
 0x93f   :  { %v1232_v30 = vadd.f32 1.0, %v2105_v58  ;;  %v2107_v5 = vpop.eup %2106 }
 0x941   :  { %2108 = vrcp.f32 %v1232_v30 }
 0x942   :  { %2110 = vrcp.f32 %v1231_v29 }
 0x94b   :  { %v2109_v6 = vpop.eup %2108 }
 0x94c   :  { %v2111_v63 = vpop.eup %2110  ;;  %v1238_v31 = vsel %vm369_vm6, %v2107_v5, %v2109_v6 }
 0x94d   :  { %v1240_v32 = vmul.f32 %v2111_v63, %v1238_v31  ;;  %v1239_v9 = vmul.f32 %v2111_v63, %v1140_v53 }
 0x94f   :  { %1242 = vrot.lane.b32.xlu0 %v1240_v32, %s2291_s10 }
 0x9c1   :  { %v1243_v10 = vpop.permute.xlu0 %1242 }
 0x9c2   :  { %v1245_v11 = vadd.f32 %v1243_v10, %v1239_v9 }
 0x9c4   :  { %2112 = vtanh.f32 %v1245_v11 }
 0x9ce   :  { %v2113_v33 = vpop.eup %2112 }
 0x9cf   :  { %v1247_v19 = vmul.f32 %v2113_v33, %v1238_v31 }
 0x9d1   :  { %1251 = vrot.lane.b32.xlu1 %v1247_v19, %s2291_s10  ;;  %v2292_v19 = vmov 0.0|0.0  }
 0x9d2   :  { %2027 = vmatprep.subr.bf16.mxu0 %v2292_v19 }
 0xa43   :  { %v1252_v34 = vpop.permute.xlu1 %1251 }
 0xa44   :  { %1790 = vmatmul.mubr.msk.f32.vlgmr.msra.gmra.mrb[8].mxu1 %vm462_vm7, %v1252_v34  ;;  %v2028_v34 = vpack.c.bf16 %v1564_v8, %v1563_v2 }
 0xa45   :  { %2014 = vmatpush1.bf16.msra.mxu1 %v2408_v51  ;;  %1529 = vmatprep.mubr.f32.mxu1 %v2289_v12 }
 0xa46   :  { %2016 = vmatprep.subr.bf16.mxu1 %v2411_v59 }
 0xa49   :  { %2018 = vmatpush1.bf16.msra.mxu1 %v2414_v0 }
 0xa4a   :  { %2020 = vmatprep.subr.bf16.mxu1 %v2417_v1 }
 0xa4d   :  { %2022 = vmatpush1.bf16.msra.mxu1 %v2420_v13 }
 0xa4e   :  { %2024 = vmatprep.subr.bf16.mxu1 %v2423_v14 }
 0xa51   :  { %2026 = vmatpush1.bf16.msra.mxu1 %v2426_v23 }
 0xb17   :  { %v1321_v50 = vpop.f32.mrb[8].mxu1 }
 0xb18   :  { %v1326_v51 = vadd.f32 %v1321_v50, %v1248_v61  ;;  %v1323_v35 = vpop.f32.mrb[9].mxu1  ;;  %v1566_v50 = vld [vmem:[#allocation11 + $0x18] sm:$0xff] }
 0xb19   :  { %v1327_v59 = vadd.f32 %v1323_v35, %v1249_v15  ;;  %v1567_v35 = vld [vmem:[#allocation11 + $0x20] sm:$0xff] }
 0xb1a   :  { %v1791_v0 = vmul.f32 -1.442695, %v1326_v51 }
 0xb1b   :  { %v1792_v1 = vmul.f32 -1.442695, %v1327_v59 }
 0xb1c   :  { %2114 = vpow2.f32 %v1791_v0  ;;  %v1569_v0 = vld [vmem:[#allocation11 + $0x30] sm:$0xff] }
 0xb1d   :  { %2116 = vpow2.f32 %v1792_v1  ;;  %v1570_v1 = vld [vmem:[#allocation11 + $0x38] sm:$0xff] }
 0xb1e   :  { %2118 = vtanh.f32 %v1327_v59  ;;  %v1568_v59 = vld [vmem:[#allocation11 + $0x28] sm:$0xff] }
 0xb1f   :  { %v2034_v37 = vpack.c.bf16 %v1568_v59, %v1567_v35 }
 0xb26   :  { %v2115_v13 = vpop.eup %2114 }
 0xb27   :  { %v2117_v14 = vpop.eup %2116  ;;  %v1336_v23 = vadd.f32 1.0, %v2115_v13  ;;  %v2037_v13 = vpack.c.bf16 %v1570_v1, %v1569_v0 }
 0xb28   :  { %v1337_v36 = vadd.f32 1.0, %v2117_v14  ;;  %v2119_v43 = vpop.eup %2118 }
 0xb2a   :  { %2120 = vrcp.f32 %v1337_v36 }
 0xb2b   :  { %2122 = vrcp.f32 %v1336_v23 }
 0xb34   :  { %v2121_v45 = vpop.eup %2120 }
 0xb35   :  { %v2123_v61 = vpop.eup %2122  ;;  %v1343_v38 = vsel %vm369_vm6, %v2119_v43, %v2121_v45 }
 0xb36   :  { %v1345_v39 = vmul.f32 %v2123_v61, %v1343_v38  ;;  %v1344_v46 = vmul.f32 %v2123_v61, %v1245_v11  ;;  %v1799_v61 = vld [vmem:[%s2919_s6] ss:$0 sm:$0xff] }
 0xb38   :  { %1347 = vrot.lane.b32.xlu0 %v1345_v39, %s2291_s10 }
 0xbaa   :  { %v1348_v55 = vpop.permute.xlu0 %1347 }
 0xbab   :  { %v1350_v15 = vadd.f32 %v1348_v55, %v1344_v46 }
 0xbad   :  { %2124 = vtanh.f32 %v1350_v15 }
 0xbb7   :  { %v2125_v44 = vpop.eup %2124 }
 0xbb8   :  { %v1352_v47 = vmul.f32 %v2125_v44, %v1343_v38 }
 0xbba   :  { %1356 = vrot.lane.b32.xlu1 %v1352_v47, %s2291_s10 }
 0xc2c   :  { %v1357_v48 = vpop.permute.xlu1 %1356 }
 0xc2d   :  { %1793 = vmatmul.mubr.msk.f32.vlgmr.msra.gmra.mrb[16].mxu0 %vm462_vm7, %v1357_v48 }
 0xc2e   :  { %1842 = vmatprep.mubr.msk.f32.mxu0 %vm2293_vm8, %v2289_v12  ;;  %2029 = vmatpush3.bf16.msra.mxu0 %v2028_v34 }
 0xc2f   :  { %2030 = vmatprep.subr.bf16.mxu0 %v2292_v19 }
 0xd00   :  { %v1426_v49 = vpop.f32.mrb[16].mxu0 }
 0xd01   :  { %v1431_v52 = vadd.f32 %v1426_v49, %v1353_v16  ;;  %v1428_v53 = vpop.f32.mrb[17].mxu0 }
 0xd02   :  { %v1432_v54 = vadd.f32 %v1428_v53, %v1354_v17 }
 0xd03   :  { %v1794_v56 = vmul.f32 -1.442695, %v1431_v52 }
 0xd04   :  { %v1795_v60 = vmul.f32 -1.442695, %v1432_v54 }
 0xd05   :  { %2126 = vpow2.f32 %v1794_v56 }
 0xd06   :  { %2128 = vpow2.f32 %v1795_v60 }
 0xd07   :  { %2130 = vtanh.f32 %v1432_v54 }
 0xd0f   :  { %v2127_v3 = vpop.eup %2126 }
 0xd10   :  { %v2129_v21 = vpop.eup %2128  ;;  %v1441_v22 = vadd.f32 1.0, %v2127_v3 }
 0xd11   :  { %v1442_v24 = vadd.f32 1.0, %v2129_v21  ;;  %v2131_v28 = vpop.eup %2130 }
 0xd13   :  { %2132 = vrcp.f32 %v1442_v24 }
 0xd14   :  { %2134 = vrcp.f32 %v1441_v22 }
 0xd1d   :  { %v2133_v57 = vpop.eup %2132 }
 0xd1e   :  { %v2135_v16 = vpop.eup %2134  ;;  %v1448_v25 = vsel %vm369_vm6, %v2131_v28, %v2133_v57 }
 0xd1f   :  { %v1450_v26 = vmul.f32 %v2135_v16, %v1448_v25  ;;  %v1449_v42 = vmul.f32 %v2135_v16, %v1350_v15 }
 0xd21   :  { %1452 = vrot.lane.b32.xlu0 %v1450_v26, %s2291_s10 }
 0xd93   :  { %v1453_v4 = vpop.permute.xlu0 %1452 }
 0xd94   :  { %v1455_v17 = vadd.f32 %v1453_v4, %v1449_v42 }
 0xd96   :  { %2136 = vtanh.f32 %v1455_v17 }
 0xda0   :  { %v2137_v27 = vpop.eup %2136 }
 0xda1   :  { %v1457_v58 = vmul.f32 %v2137_v27, %v1448_v25 }
 0xda3   :  { %1461 = vrot.lane.b32.xlu1 %v1457_v58, %s2291_s10 }
 0xe15   :  { %v1462_v29 = vpop.permute.xlu1 %1461 }
 0xe16   :  { %1796 = vmatmul.mubr.msk.f32.vlgmr.msra.gmra.mrb[10].mxu1 %vm462_vm7, %v1462_v29 }
 0xee9   :  { %v1531_v30 = vpop.f32.mrb[10].mxu1 }
 0xeea   :  { %v1536_v5 = vadd.f32 %v1531_v30, %v1458_v18  ;;  %v1533_v6 = vpop.f32.mrb[11].mxu1 }
 0xeeb   :  { %v1537_v63 = vadd.f32 %v1533_v6, %v1459_v20  ;;  %v1565_v20 = vld [vmem:[#allocation11 + $0x10] sm:$0xff] }
 0xeec   :  { %v1797_v31 = vmul.f32 -1.442695, %v1536_v5  ;;  %v2031_v51 = vpack.c.bf16 %v1566_v50, %v1565_v20 }
 0xeed   :  { %v1798_v32 = vmul.f32 -1.442695, %v1537_v63 }
 0xeee   :  { %2138 = vpow2.f32 %v1797_v31  ;;  %2032 = vmatpush3.bf16.msra.mxu0 %v2031_v51 }
 0xeef   :  { %2140 = vpow2.f32 %v1798_v32  ;;  %2033 = vmatprep.subr.bf16.mxu0 %v2292_v19 }
 0xef0   :  { %2142 = vtanh.f32 %v1537_v63 }
 0xef2   :  { %2035 = vmatpush3.bf16.msra.mxu0 %v2034_v37 }
 0xef3   :  { %2036 = vmatprep.subr.bf16.mxu0 %v2292_v19 }
 0xef6   :  { %2038 = vmatpush3.bf16.msra.mxu0 %v2037_v13 }
 0xef8   :  { %v2139_v9 = vpop.eup %2138 }
 0xef9   :  { %v2141_v10 = vpop.eup %2140  ;;  %v1546_v11 = vadd.f32 1.0, %v2139_v9 }
 0xefa   :  { %v1547_v33 = vadd.f32 1.0, %v2141_v10  ;;  %v2143_v40 = vpop.eup %2142 }
 0xefc   :  { %2144 = vrcp.f32 %v1547_v33 }
 0xefd   :  { %2146 = vrcp.f32 %v1546_v11 }
 0xf06   :  { %v2145_v62 = vpop.eup %2144 }
 0xf07   :  { %v2147_v7 = vpop.eup %2146  ;;  %v1553_v41 = vsel %vm369_vm6, %v2143_v40, %v2145_v62 }
 0xf08   :  { %v1555_v18 = vmul.f32 %v2147_v7, %v1553_v41  ;;  %v1554_v14 = vmul.f32 %v2147_v7, %v1455_v17 }
 0xf0a   :  { %1557 = vrot.lane.b32.xlu0 %v1555_v18, %s2291_s10 }
 0xf7c   :  { %v1558_v23 = vpop.permute.xlu0 %1557 }
 0xf7d   :  { %v1560_v36 = vadd.f32 %v1558_v23, %v1554_v14 }
 0xf7f   :  { %2148 = vtanh.f32 %v1560_v36 }
 0xf89   :  { %v2149_v43 = vpop.eup %2148 }
 0xf8a   :  { %v1562_v12 = vmul.f32 %v2149_v43, %v1553_v41 }
 0xf8c   :  { %1579 = vrot.lane.b32.xlu1 %v1562_v12, %s2291_s10 }
 0xffe   :  { %v1580_v45 = vpop.permute.xlu1 %1579 }
 0xfff   :  { %1843 = vmatmul.mubr.msk.f32.vlgmr.msra.gmra.mrb[18].mxu0 %vm462_vm7, %v1580_v45 }
0x10d2   :  { %v1649_v38 = vpop.f32.mrb[18].mxu0 }
0x10d3   :  { %v1650_v39 = vadd.f32 %v1799_v61, %v1649_v38  ;;  %v1844_v46 = vpop.f32.mrb[19].mxu0 }
0x10d5   :  { %1653 = vst [vmem:[#allocation13] sm:$0x3] %v1650_v39 }
0x10d6   :  { %2259 = shalt.err (!%p2256_p11)
}
0x10d7   :  { %s2260_s21 = scalar_lea.hbm %s2920_s7, 32 }
0x10d8   :  { %p2261_p12 = scmp.ne.s32.totalorder %s2920_s7, %s2260_s21  ;;  %p2264_p13 = scmp.lt.u32.totalorder %s2260_s21, %s2920_s7 }
0x10da   :  { %p2266_p0 = pnand %p2264_p13, %p2261_p12 }
0x10dc   :  { %2269 = shalt.err (!%p2266_p0)
}
0x10dd   :  { %1663 = dma.vmem_to_hbm [thread:$0]  %s1661_s5, 32, %s2920_s7, [#allocation5]  }
0x10de   :  { %2278 = dma.done.wait [#allocation5], 32  }
0x10df   :  { %2279 = vsyncadd [#allocation5], 4294967264 }
0x10e0   :  { %1667 = vsyncpa [#allocation4], 1 }
0x10e1   :  { %1668 = vsyncpa [#allocation9], 1 }
0x10e2   :  { %1669 = vsyncpa [#allocation12], 1 }
0x10e3   :  { %1670 = vsyncpa [#allocation5], 1 }
0x10e4   :  { %1671 = vsyncpa [#allocation6], 1 }

</bundles_post_ra>
